<compile_context>
chip_gen: v7x
topology: tpu7x:2x2x1
jax: 0.10.0
libtpu: 0.0.40
codegen_flags: <defaults>
</compile_context>

<pallas_src>
import jax
import jax.numpy as jnp
from jax.experimental import pallas as pl
from jax.experimental.pallas import tpu as pltpu

_EPS = 1e-5
_TM, _TN = 512, 512                    # tile caps; K is never tiled (K <= a few K)
_VMEM_LIMIT = 32 * 1024 * 1024         # well above worst-case ~10-17 MiB double-buffered


# ----------------------------------------------------------------------------
# helpers
# ----------------------------------------------------------------------------
def _round_up(x, m):
    return (x + m - 1) // m * m


def _tile_dim(d, cap, quantum):
    """Tile size <= cap (multiple of `quantum`) and padded extent it divides."""
    dq = _round_up(d, quantum)
    t = min(cap, dq)
    return t, _round_up(d, t)


# ----------------------------------------------------------------------------
# Pallas kernels: phase-batched GEMM, full-K per step, bf16 MXU, f32 accumulate.
#   grid = (phase, M-tile, N-tile), all parallel (no reduction axis).
#   BN variant also emits per-tile column sums / sums-of-squares (f32).
# ----------------------------------------------------------------------------
def _gemm_bn_kernel(a_ref, b_ref, o_ref, s1_ref, s2_ref):
    acc = jnp.dot(a_ref[...], b_ref[...], preferred_element_type=jnp.float32)
    s1_ref[...] = jnp.sum(acc, axis=0, keepdims=True)          # (1, tn) f32
    s2_ref[...] = jnp.sum(acc * acc, axis=0, keepdims=True)    # (1, tn) f32
    o_ref[...] = acc.astype(o_ref.dtype)                       # bf16 store


def _gemm_tanh_kernel(a_ref, b_ref, o_ref):
    acc = jnp.dot(a_ref[...], b_ref[...], preferred_element_type=jnp.float32)
    o_ref[...] = jnp.tanh(acc).astype(o_ref.dtype)


def pallas_conv_gemm(patches, w_mats, *, with_stats):
    """patches: (P, M, K) bf16, w_mats: (P, K, Nc) bf16. K, Nc multiples of 128.

    Returns y (P, Mp, Np) bf16 (padded rows/cols exactly zero), and if with_stats
    also (s1, s2), each (P, Mp//tm, 1, Np) f32 per-tile column partials."""
    P, M, K = patches.shape
    Pw, Kw, Nc = w_mats.shape
    assert P == Pw and K == Kw and K % 128 == 0 and Nc % 128 == 0

    tm, Mp = _tile_dim(M, _TM, 16)       # bf16 sublane packing (16)
    tn, Np = _tile_dim(Nc, _TN, 128)     # lane-dense output
    if Mp != M:
        patches = jnp.pad(patches, ((0, 0), (0, Mp - M), (0, 0)))
    if Np != Nc:
        w_mats = jnp.pad(w_mats, ((0, 0), (0, 0), (0, Np - Nc)))

    grid = (P, Mp // tm, Np // tn)
    a_spec = pl.BlockSpec((None, tm, K), lambda p, i, j: (p, i, 0))
    b_spec = pl.BlockSpec((None, K, tn), lambda p, i, j: (p, 0, j))
    y_spec = pl.BlockSpec((None, tm, tn), lambda p, i, j: (p, i, j))
    y_shape = jax.ShapeDtypeStruct((P, Mp, Np), jnp.bfloat16)

    flops = 2 * P * Mp * K * Np
    act_bytes = 2 * P * (Mp * K + K * Np + Mp * Np)
    params = pltpu.CompilerParams(
        dimension_semantics=("parallel", "parallel", "parallel"),
        vmem_limit_bytes=_VMEM_LIMIT)

    if with_stats:
        s_spec = pl.BlockSpec((None, None, 1, tn), lambda p, i, j: (p, i, 0, j))
        s_shape = jax.ShapeDtypeStruct((P, Mp // tm, 1, Np), jnp.float32)
        return pl.pallas_call(
            _gemm_bn_kernel,
            out_shape=(y_shape, s_shape, s_shape),
            grid_spec=pltpu.PrefetchScalarGridSpec(
                num_scalar_prefetch=0, grid=grid,
                in_specs=[a_spec, b_spec],
                out_specs=(y_spec, s_spec, s_spec)),
            compiler_params=params,
            cost_estimate=pl.CostEstimate(
                flops=flops, transcendentals=0,
                bytes_accessed=act_bytes + 8 * P * (Mp // tm) * Np),
        )(patches, w_mats)

    return pl.pallas_call(
        _gemm_tanh_kernel,
        out_shape=y_shape,
        grid_spec=pltpu.PrefetchScalarGridSpec(
            num_scalar_prefetch=0, grid=grid,
            in_specs=[a_spec, b_spec], out_specs=y_spec),
        compiler_params=params,
        cost_estimate=pl.CostEstimate(
            flops=flops, transcendentals=P * Mp * Np, bytes_accessed=act_bytes),
    )(patches, w_mats)


# ----------------------------------------------------------------------------
# ConvTranspose2d lowerings (NHWC activations, PyTorch weight layout (Ci,Co,kh,kw))
# ----------------------------------------------------------------------------
def _s1_patches(x, ci_pad):
    """ConvTranspose2d(k=4, stride=1, pad=0) im2col. x: (N,H,W,Ci) f32 -> bf16 patches."""
    N, H, W, Ci = x.shape
    k = 4
    xb = jnp.pad(x.astype(jnp.bfloat16), ((0, 0), (0, 0), (0, 0), (0, ci_pad - Ci)))
    xp = jnp.pad(xb, ((0, 0), (k - 1, k - 1), (k - 1, k - 1), (0, 0)))
    OH, OW = H + k - 1, W + k - 1
    cols = [xp[:, kh:kh + OH, kw:kw + OW, :] for kh in range(k) for kw in range(k)]
    patches = jnp.concatenate(cols, axis=-1).reshape(N * OH * OW, k * k * ci_pad)
    return patches[None], (OH, OW)                     # (1, M, K) bf16


def _s1_wmat(w, ci_pad, co_pad):
    Ci, Co, k, _ = w.shape
    wp = jnp.pad(w, ((0, ci_pad - Ci), (0, co_pad - Co), (0, 0), (0, 0)))
    wm = wp[:, :, ::-1, ::-1].transpose(2, 3, 0, 1).reshape(k * k * ci_pad, co_pad)
    return wm[None].astype(jnp.bfloat16)               # (1, K, Np)


def _phase_patches(x_bn, ci_pad):
    """ConvTranspose2d(k=4, s=2, p=1) phase decomposition: output pixels grouped by
    (oh%2, ow%2); each phase needs only 4 kernel taps -> K = 4*ci_pad, no stride
    dilation zeros. x_bn: (N,H,W,Ci) f32 (BN already applied; zero spatial pad is
    therefore exact). Returns (4, N*H*W, 4*ci_pad) bf16, phase order (a,b) row-major."""
    N, H, W, Ci = x_bn.shape
    xb = jnp.pad(x_bn.astype(jnp.bfloat16), ((0, 0), (0, 0), (0, 0), (0, ci_pad - Ci)))
    xq = jnp.pad(xb, ((0, 0), (1, 1), (1, 1), (0, 0)))
    phases = []
    for a in range(2):
        for b in range(2):
            cols = [xq[:, a + dh:a + dh + H, b + dw:b + dw + W, :]
                    for dh in range(2) for dw in range(2)]
            phases.append(jnp.concatenate(cols, axis=-1).reshape(N * H * W, 4 * ci_pad))
    return jnp.stack(phases, axis=0)


def _phase_wmats(w, ci_pad, co_pad):
    """w: (Ci, Co, 4, 4) f32 -> (4, 4*ci_pad, co_pad) bf16, matching _phase_patches."""
    Ci, Co = w.shape[:2]
    wp = jnp.pad(w, ((0, ci_pad - Ci), (0, co_pad - Co), (0, 0), (0, 0)))
    mats = []
    for a in range(2):
        for b in range(2):
            rows = [wp[:, :, 3 - (a + 2 * dh), 3 - (b + 2 * dw)]
                    for dh in range(2) for dw in range(2)]
            mats.append(jnp.concatenate(rows, axis=0))
    return jnp.stack(mats, axis=0).astype(jnp.bfloat16)


def _interleave(y_phases, N, H, W, Co):
    """(4, Mp, Np) phase outputs -> (N, 2H, 2W, Co) with out[:, 2h+a, 2w+b] = phase(a,b)."""
    z = y_phases[:, :N * H * W, :Co].reshape(2, 2, N, H, W, Co)
    z = z.transpose(2, 3, 0, 4, 1, 5)                   # (N, H, a, W, b, Co)
    return z.reshape(N, 2 * H, 2 * W, Co)


# ----------------------------------------------------------------------------
# BatchNorm (training-mode batch stats) from in-kernel partial sums
# ----------------------------------------------------------------------------
def _bn_from_stats(s1_t, s2_t, count, gamma, beta, co):
    s1 = jnp.sum(s1_t[..., :co], axis=(0, 1, 2))        # padded rows contribute 0
    s2 = jnp.sum(s2_t[..., :co], axis=(0, 1, 2))
    mu = s1 / count
    var = jnp.maximum(s2 / count - mu * mu, 0.0)         # biased variance (BN training)
    scale = gamma * jax.lax.rsqrt(var + _EPS)
    shift = beta - mu * scale
    return scale, shift


# ----------------------------------------------------------------------------
# Layers. Each BN layer returns the RAW conv output plus (scale, shift); the affine
# is applied exactly (before zero-padding) when the next layer builds its patches.
# nn.LeakyReLU(True) -> negative_slope == 1.0 -> identity -> elided.
# ----------------------------------------------------------------------------
def layer1_s1_bn(z_nhwc, w, gamma, beta):
    """ConvTranspose2d(nz, ngf*8, 4, 1, 0) + BatchNorm (stats fused in-kernel)."""
    N, _, _, Ci = z_nhwc.shape
    Co = w.shape[1]
    ci_pad = _round_up(Ci, 8)                            # 16*ci_pad % 128 == 0
    co_pad = _round_up(Co, 128)
    patches, (OH, OW) = _s1_patches(z_nhwc, ci_pad)
    wm = _s1_wmat(w, ci_pad, co_pad)
    y, s1t, s2t = pallas_conv_gemm(patches, wm, with_stats=True)
    scale, shift = _bn_from_stats(s1t, s2t, N * OH * OW, gamma, beta, Co)
    act = y[0, :N * OH * OW, :Co].reshape(N, OH, OW, Co)  # raw (pre-BN), bf16
    return act, scale, shift


def _s2_conv(act_raw, scale, shift, w, *, with_stats):
    N, H, W, Ci = act_raw.shape
    Co = w.shape[1]
    ci_pad = _round_up(Ci, 32)                           # 4*ci_pad % 128 == 0
    co_pad = _round_up(Co, 128)
    x_bn = act_raw.astype(jnp.float32) * scale + shift   # fuses into patch build
    patches = _phase_patches(x_bn, ci_pad)
    wm = _phase_wmats(w, ci_pad, co_pad)
    return pallas_conv_gemm(patches, wm, with_stats=with_stats), (N, H, W, Co)


def layer_s2_bn(act_raw, scale, shift, w, gamma, beta):
    """BN(prev) -> ConvTranspose2d(Ci, Co, 4, 2, 1) -> BatchNorm stats (fused)."""
    (y, s1t, s2t), (N, H, W, Co) = _s2_conv(act_raw, scale, shift, w, with_stats=True)
    scale2, shift2 = _bn_from_stats(s1t, s2t, 4 * N * H * W, gamma, beta, Co)
    return _interleave(y, N, H, W, Co), scale2, shift2


def layer_s2_tanh(act_raw, scale, shift, w):
    """BN(prev) -> ConvTranspose2d(ngf, nc, 4, 2, 1) -> Tanh (fused in GEMM epilogue)."""
    y, (N, H, W, Co) = _s2_conv(act_raw, scale, shift, w, with_stats=False)
    return _interleave(y, N, H, W, Co)


# ----------------------------------------------------------------------------
# Generator
# ----------------------------------------------------------------------------
def init_generator_params(key, nz, ngf, nc):
    chans = [nz, ngf * 8, ngf * 4, ngf * 2, ngf, nc]
    params = []
    for i in range(5):
        key, wk = jax.random.split(key)
        ci, co = chans[i], chans[i + 1]
        w = jax.random.normal(wk, (ci, co, 4, 4), jnp.float32) * 0.02
        gamma = jnp.ones((co,), jnp.float32)             # BatchNorm2d affine init
        beta = jnp.zeros((co,), jnp.float32)
        params.append((w, gamma, beta))
    return params


@jax.jit
def generator_forward(z_nchw, params):
    """z: (N, nz, 1, 1) NCHW -> (N, nc, 64, 64) NCHW (matches PyTorch Generator)."""
    (w1, g1, b1), (w2, g2, b2), (w3, g3, b3), (w4, g4, b4), (w5, _, _) = params
    x = z_nchw.transpose(0, 2, 3, 1)                     # NCHW -> NHWC once
    act, scale, shift = layer1_s1_bn(x, w1, g1, b1)
    act, scale, shift = layer_s2_bn(act, scale, shift, w2, g2, b2)
    act, scale, shift = layer_s2_bn(act, scale, shift, w3, g3, b3)
    act, scale, shift = layer_s2_bn(act, scale, shift, w4, g4, b4)
    out = layer_s2_tanh(act, scale, shift, w5)
    return out.transpose(0, 3, 1, 2).astype(jnp.float32)  # NHWC -> NCHW boundary


if __name__ == "__main__":
    # small config: nz=8, ngf=8, nc=1, batch=2
    nz, ngf, nc, batch = 8, 8, 1, 2
    key = jax.random.PRNGKey(0)
    key, xk = jax.random.split(key)
    z = jax.random.normal(xk, (batch, nz, 1, 1), jnp.float32)   # NCHW latent

    params = init_generator_params(key, nz, ngf, nc)
    out = generator_forward(z, params)
    out = jax.block_until_ready(out)

    assert out.shape == (batch, nc, 64, 64), out.shape
    assert bool(jnp.all(jnp.isfinite(out)))
    assert bool(jnp.all(jnp.abs(out) <= 1.0 + 1e-3))     # tanh range sanity
    print("KERNEL_OK")
</pallas_src>

<mosaic_0001>
module attributes {stable_mosaic.version = 11 : i64} {
  func.func @_gemm_bn_kernel(%arg0: i32, %arg1: i32, %arg2: i32, %arg3: memref<1x32x128xbf16, #tpu.memory_space<vmem>>, %arg4: memref<1x128x128xbf16, #tpu.memory_space<vmem>>, %arg5: memref<1x32x128xbf16, #tpu.memory_space<vmem>>, %arg6: memref<1x1x1x128xf32, #tpu.memory_space<vmem>>, %arg7: memref<1x1x1x128xf32, #tpu.memory_space<vmem>>) attributes {dimension_semantics = [#tpu.dimension_semantics<parallel>, #tpu.dimension_semantics<parallel>, #tpu.dimension_semantics<parallel>], iteration_bounds = array<i64: 1, 1, 1>, scalar_prefetch = 0 : i64, scratch_operands = 0 : i64, tpu.core_type = #tpu.core_type<tc>, window_params = [{transform_indices = @transform_0, window_bounds = array<i64: 1, 32, 128>}, {transform_indices = @transform_1, window_bounds = array<i64: 1, 128, 128>}, {transform_indices = @transform_2, window_bounds = array<i64: 1, 32, 128>}, {transform_indices = @transform_3, window_bounds = array<i64: 1, 1, 1, 128>}, {transform_indices = @transform_4, window_bounds = array<i64: 1, 1, 1, 128>}]} {
    %c0 = arith.constant 0 : index
    %c0_0 = arith.constant 0 : index
    %c0_1 = arith.constant 0 : index
    %0 = vector.load %arg3[%c0, %c0_0, %c0_1] : memref<1x32x128xbf16, #tpu.memory_space<vmem>>, vector<1x32x128xbf16>
    %1 = vector.shape_cast %0 : vector<1x32x128xbf16> to vector<32x128xbf16>
    %c0_2 = arith.constant 0 : index
    %c0_3 = arith.constant 0 : index
    %c0_4 = arith.constant 0 : index
    %2 = vector.load %arg4[%c0_2, %c0_3, %c0_4] : memref<1x128x128xbf16, #tpu.memory_space<vmem>>, vector<1x128x128xbf16>
    %3 = vector.shape_cast %2 : vector<1x128x128xbf16> to vector<128x128xbf16>
    %cst = arith.constant dense<0.000000e+00> : vector<32x128xf32>
    %4 = tpu.matmul %1, %3, %cst {dimension_numbers = #tpu.dot_dimension_numbers<[1], [0], [0], [1], [0, 0, 1, 1], [], []>} : vector<32x128xbf16>, vector<128x128xbf16>, vector<32x128xf32> -> vector<32x128xf32>
    %cst_5 = arith.constant dense<0.000000e+00> : vector<128xf32>
    %5 = vector.multi_reduction <add>, %4, %cst_5 [0] : vector<32x128xf32> to vector<128xf32>
    %6 = vector.shape_cast %5 : vector<128xf32> to vector<1x128xf32>
    %c0_6 = arith.constant 0 : index
    %c0_7 = arith.constant 0 : index
    %c0_8 = arith.constant 0 : index
    %c0_9 = arith.constant 0 : index
    %7 = vector.load %arg6[%c0_6, %c0_7, %c0_8, %c0_9] : memref<1x1x1x128xf32, #tpu.memory_space<vmem>>, vector<1x1x1x128xf32>
    %8 = vector.shape_cast %7 : vector<1x1x1x128xf32> to vector<1x128xf32>
    %9 = vector.shape_cast %6 : vector<1x128xf32> to vector<1x1x1x128xf32>
    tpu.vector_store %arg6[%c0_6, %c0_7, %c0_8, %c0_9], %9 {strides = array<i32>} : memref<1x1x1x128xf32, #tpu.memory_space<vmem>>, vector<1x1x1x128xf32>,
    %10 = arith.mulf %4, %4 : vector<32x128xf32>
    %cst_10 = arith.constant dense<0.000000e+00> : vector<128xf32>
    %11 = vector.multi_reduction <add>, %10, %cst_10 [0] : vector<32x128xf32> to vector<128xf32>
    %12 = vector.shape_cast %11 : vector<128xf32> to vector<1x128xf32>
    %c0_11 = arith.constant 0 : index
    %c0_12 = arith.constant 0 : index
    %c0_13 = arith.constant 0 : index
    %c0_14 = arith.constant 0 : index
    %13 = vector.load %arg7[%c0_11, %c0_12, %c0_13, %c0_14] : memref<1x1x1x128xf32, #tpu.memory_space<vmem>>, vector<1x1x1x128xf32>
    %14 = vector.shape_cast %13 : vector<1x1x1x128xf32> to vector<1x128xf32>
    %15 = vector.shape_cast %12 : vector<1x128xf32> to vector<1x1x1x128xf32>
    tpu.vector_store %arg7[%c0_11, %c0_12, %c0_13, %c0_14], %15 {strides = array<i32>} : memref<1x1x1x128xf32, #tpu.memory_space<vmem>>, vector<1x1x1x128xf32>,
    %16 = arith.truncf %4 : vector<32x128xf32> to vector<32x128xbf16>
    %c0_15 = arith.constant 0 : index
    %c0_16 = arith.constant 0 : index
    %c0_17 = arith.constant 0 : index
    %17 = vector.load %arg5[%c0_15, %c0_16, %c0_17] : memref<1x32x128xbf16, #tpu.memory_space<vmem>>, vector<1x32x128xbf16>
    %18 = vector.shape_cast %17 : vector<1x32x128xbf16> to vector<32x128xbf16>
    %19 = vector.shape_cast %16 : vector<32x128xbf16> to vector<1x32x128xbf16>
    tpu.vector_store %arg5[%c0_15, %c0_16, %c0_17], %19 {strides = array<i32>} : memref<1x32x128xbf16, #tpu.memory_space<vmem>>, vector<1x32x128xbf16>,
    return
  }
  func.func @transform_0(%arg0: i32, %arg1: i32, %arg2: i32) -> (i32, i32, i32) {
    %c0_i32 = arith.constant 0 : i32
    %c0_i32_0 = arith.constant 0 : i32
    return %arg0, %arg1, %c0_i32 : i32, i32, i32
  }
  func.func @transform_1(%arg0: i32, %arg1: i32, %arg2: i32) -> (i32, i32, i32) {
    %c0_i32 = arith.constant 0 : i32
    %c0_i32_0 = arith.constant 0 : i32
    return %arg0, %c0_i32, %arg2 : i32, i32, i32
  }
  func.func @transform_2(%arg0: i32, %arg1: i32, %arg2: i32) -> (i32, i32, i32) {
    %c0_i32 = arith.constant 0 : i32
    return %arg0, %arg1, %arg2 : i32, i32, i32
  }
  func.func @transform_3(%arg0: i32, %arg1: i32, %arg2: i32) -> (i32, i32, i32, i32) {
    %c0_i32 = arith.constant 0 : i32
    %c0_i32_0 = arith.constant 0 : i32
    return %arg0, %arg1, %c0_i32, %arg2 : i32, i32, i32, i32
  }
  func.func @transform_4(%arg0: i32, %arg1: i32, %arg2: i32) -> (i32, i32, i32, i32) {
    %c0_i32 = arith.constant 0 : i32
    %c0_i32_0 = arith.constant 0 : i32
    return %arg0, %arg1, %c0_i32, %arg2 : i32, i32, i32, i32
  }
}

module attributes {stable_mosaic.version = 11 : i64} {
  func.func @_gemm_bn_kernel(%arg0: i32, %arg1: i32, %arg2: i32, %arg3: memref<1x32x256xbf16, #tpu.memory_space<vmem>>, %arg4: memref<1x256x128xbf16, #tpu.memory_space<vmem>>, %arg5: memref<1x32x128xbf16, #tpu.memory_space<vmem>>, %arg6: memref<1x1x1x128xf32, #tpu.memory_space<vmem>>, %arg7: memref<1x1x1x128xf32, #tpu.memory_space<vmem>>) attributes {dimension_semantics = [#tpu.dimension_semantics<parallel>, #tpu.dimension_semantics<parallel>, #tpu.dimension_semantics<parallel>], iteration_bounds = array<i64: 4, 1, 1>, scalar_prefetch = 0 : i64, scratch_operands = 0 : i64, tpu.core_type = #tpu.core_type<tc>, window_params = [{transform_indices = @transform_0, window_bounds = array<i64: 1, 32, 256>}, {transform_indices = @transform_1, window_bounds = array<i64: 1, 256, 128>}, {transform_indices = @transform_2, window_bounds = array<i64: 1, 32, 128>}, {transform_indices = @transform_3, window_bounds = array<i64: 1, 1, 1, 128>}, {transform_indices = @transform_4, window_bounds = array<i64: 1, 1, 1, 128>}]} {
    %c0 = arith.constant 0 : index
    %c0_0 = arith.constant 0 : index
    %c0_1 = arith.constant 0 : index
    %0 = vector.load %arg3[%c0, %c0_0, %c0_1] : memref<1x32x256xbf16, #tpu.memory_space<vmem>>, vector<1x32x256xbf16>
    %1 = vector.shape_cast %0 : vector<1x32x256xbf16> to vector<32x256xbf16>
    %c0_2 = arith.constant 0 : index
    %c0_3 = arith.constant 0 : index
    %c0_4 = arith.constant 0 : index
    %2 = vector.load %arg4[%c0_2, %c0_3, %c0_4] : memref<1x256x128xbf16, #tpu.memory_space<vmem>>, vector<1x256x128xbf16>
    %3 = vector.shape_cast %2 : vector<1x256x128xbf16> to vector<256x128xbf16>
    %cst = arith.constant dense<0.000000e+00> : vector<32x128xf32>
    %4 = tpu.matmul %1, %3, %cst {dimension_numbers = #tpu.dot_dimension_numbers<[1], [0], [0], [1], [0, 0, 1, 1], [], []>} : vector<32x256xbf16>, vector<256x128xbf16>, vector<32x128xf32> -> vector<32x128xf32>
    %cst_5 = arith.constant dense<0.000000e+00> : vector<128xf32>
    %5 = vector.multi_reduction <add>, %4, %cst_5 [0] : vector<32x128xf32> to vector<128xf32>
    %6 = vector.shape_cast %5 : vector<128xf32> to vector<1x128xf32>
    %c0_6 = arith.constant 0 : index
    %c0_7 = arith.constant 0 : index
    %c0_8 = arith.constant 0 : index
    %c0_9 = arith.constant 0 : index
    %7 = vector.load %arg6[%c0_6, %c0_7, %c0_8, %c0_9] : memref<1x1x1x128xf32, #tpu.memory_space<vmem>>, vector<1x1x1x128xf32>
    %8 = vector.shape_cast %7 : vector<1x1x1x128xf32> to vector<1x128xf32>
    %9 = vector.shape_cast %6 : vector<1x128xf32> to vector<1x1x1x128xf32>
    tpu.vector_store %arg6[%c0_6, %c0_7, %c0_8, %c0_9], %9 {strides = array<i32>} : memref<1x1x1x128xf32, #tpu.memory_space<vmem>>, vector<1x1x1x128xf32>,
    %10 = arith.mulf %4, %4 : vector<32x128xf32>
    %cst_10 = arith.constant dense<0.000000e+00> : vector<128xf32>
    %11 = vector.multi_reduction <add>, %10, %cst_10 [0] : vector<32x128xf32> to vector<128xf32>
    %12 = vector.shape_cast %11 : vector<128xf32> to vector<1x128xf32>
    %c0_11 = arith.constant 0 : index
    %c0_12 = arith.constant 0 : index
    %c0_13 = arith.constant 0 : index
    %c0_14 = arith.constant 0 : index
    %13 = vector.load %arg7[%c0_11, %c0_12, %c0_13, %c0_14] : memref<1x1x1x128xf32, #tpu.memory_space<vmem>>, vector<1x1x1x128xf32>
    %14 = vector.shape_cast %13 : vector<1x1x1x128xf32> to vector<1x128xf32>
    %15 = vector.shape_cast %12 : vector<1x128xf32> to vector<1x1x1x128xf32>
    tpu.vector_store %arg7[%c0_11, %c0_12, %c0_13, %c0_14], %15 {strides = array<i32>} : memref<1x1x1x128xf32, #tpu.memory_space<vmem>>, vector<1x1x1x128xf32>,
    %16 = arith.truncf %4 : vector<32x128xf32> to vector<32x128xbf16>
    %c0_15 = arith.constant 0 : index
    %c0_16 = arith.constant 0 : index
    %c0_17 = arith.constant 0 : index
    %17 = vector.load %arg5[%c0_15, %c0_16, %c0_17] : memref<1x32x128xbf16, #tpu.memory_space<vmem>>, vector<1x32x128xbf16>
    %18 = vector.shape_cast %17 : vector<1x32x128xbf16> to vector<32x128xbf16>
    %19 = vector.shape_cast %16 : vector<32x128xbf16> to vector<1x32x128xbf16>
    tpu.vector_store %arg5[%c0_15, %c0_16, %c0_17], %19 {strides = array<i32>} : memref<1x32x128xbf16, #tpu.memory_space<vmem>>, vector<1x32x128xbf16>,
    return
  }
  func.func @transform_0(%arg0: i32, %arg1: i32, %arg2: i32) -> (i32, i32, i32) {
    %c0_i32 = arith.constant 0 : i32
    %c0_i32_0 = arith.constant 0 : i32
    return %arg0, %arg1, %c0_i32 : i32, i32, i32
  }
  func.func @transform_1(%arg0: i32, %arg1: i32, %arg2: i32) -> (i32, i32, i32) {
    %c0_i32 = arith.constant 0 : i32
    %c0_i32_0 = arith.constant 0 : i32
    return %arg0, %c0_i32, %arg2 : i32, i32, i32
  }
  func.func @transform_2(%arg0: i32, %arg1: i32, %arg2: i32) -> (i32, i32, i32) {
    %c0_i32 = arith.constant 0 : i32
    return %arg0, %arg1, %arg2 : i32, i32, i32
  }
  func.func @transform_3(%arg0: i32, %arg1: i32, %arg2: i32) -> (i32, i32, i32, i32) {
    %c0_i32 = arith.constant 0 : i32
    %c0_i32_0 = arith.constant 0 : i32
    return %arg0, %arg1, %c0_i32, %arg2 : i32, i32, i32, i32
  }
  func.func @transform_4(%arg0: i32, %arg1: i32, %arg2: i32) -> (i32, i32, i32, i32) {
    %c0_i32 = arith.constant 0 : i32
    %c0_i32_0 = arith.constant 0 : i32
    return %arg0, %arg1, %c0_i32, %arg2 : i32, i32, i32, i32
  }
}

module attributes {stable_mosaic.version = 11 : i64} {
  func.func @_gemm_bn_kernel(%arg0: i32, %arg1: i32, %arg2: i32, %arg3: memref<1x128x128xbf16, #tpu.memory_space<vmem>>, %arg4: memref<1x128x128xbf16, #tpu.memory_space<vmem>>, %arg5: memref<1x128x128xbf16, #tpu.memory_space<vmem>>, %arg6: memref<1x1x1x128xf32, #tpu.memory_space<vmem>>, %arg7: memref<1x1x1x128xf32, #tpu.memory_space<vmem>>) attributes {dimension_semantics = [#tpu.dimension_semantics<parallel>, #tpu.dimension_semantics<parallel>, #tpu.dimension_semantics<parallel>], iteration_bounds = array<i64: 4, 1, 1>, scalar_prefetch = 0 : i64, scratch_operands = 0 : i64, tpu.core_type = #tpu.core_type<tc>, window_params = [{transform_indices = @transform_0, window_bounds = array<i64: 1, 128, 128>}, {transform_indices = @transform_1, window_bounds = array<i64: 1, 128, 128>}, {transform_indices = @transform_2, window_bounds = array<i64: 1, 128, 128>}, {transform_indices = @transform_3, window_bounds = array<i64: 1, 1, 1, 128>}, {transform_indices = @transform_4, window_bounds = array<i64: 1, 1, 1, 128>}]} {
    %c0 = arith.constant 0 : index
    %c0_0 = arith.constant 0 : index
    %c0_1 = arith.constant 0 : index
    %0 = vector.load %arg3[%c0, %c0_0, %c0_1] : memref<1x128x128xbf16, #tpu.memory_space<vmem>>, vector<1x128x128xbf16>
    %1 = vector.shape_cast %0 : vector<1x128x128xbf16> to vector<128x128xbf16>
    %c0_2 = arith.constant 0 : index
    %c0_3 = arith.constant 0 : index
    %c0_4 = arith.constant 0 : index
    %2 = vector.load %arg4[%c0_2, %c0_3, %c0_4] : memref<1x128x128xbf16, #tpu.memory_space<vmem>>, vector<1x128x128xbf16>
    %3 = vector.shape_cast %2 : vector<1x128x128xbf16> to vector<128x128xbf16>
    %cst = arith.constant dense<0.000000e+00> : vector<128x128xf32>
    %4 = tpu.matmul %1, %3, %cst {dimension_numbers = #tpu.dot_dimension_numbers<[1], [0], [0], [1], [0, 0, 1, 1], [], []>} : vector<128x128xbf16>, vector<128x128xbf16>, vector<128x128xf32> -> vector<128x128xf32>
    %cst_5 = arith.constant dense<0.000000e+00> : vector<128xf32>
    %5 = vector.multi_reduction <add>, %4, %cst_5 [0] : vector<128x128xf32> to vector<128xf32>
    %6 = vector.shape_cast %5 : vector<128xf32> to vector<1x128xf32>
    %c0_6 = arith.constant 0 : index
    %c0_7 = arith.constant 0 : index
    %c0_8 = arith.constant 0 : index
    %c0_9 = arith.constant 0 : index
    %7 = vector.load %arg6[%c0_6, %c0_7, %c0_8, %c0_9] : memref<1x1x1x128xf32, #tpu.memory_space<vmem>>, vector<1x1x1x128xf32>
    %8 = vector.shape_cast %7 : vector<1x1x1x128xf32> to vector<1x128xf32>
    %9 = vector.shape_cast %6 : vector<1x128xf32> to vector<1x1x1x128xf32>
    tpu.vector_store %arg6[%c0_6, %c0_7, %c0_8, %c0_9], %9 {strides = array<i32>} : memref<1x1x1x128xf32, #tpu.memory_space<vmem>>, vector<1x1x1x128xf32>,
    %10 = arith.mulf %4, %4 : vector<128x128xf32>
    %cst_10 = arith.constant dense<0.000000e+00> : vector<128xf32>
    %11 = vector.multi_reduction <add>, %10, %cst_10 [0] : vector<128x128xf32> to vector<128xf32>
    %12 = vector.shape_cast %11 : vector<128xf32> to vector<1x128xf32>
    %c0_11 = arith.constant 0 : index
    %c0_12 = arith.constant 0 : index
    %c0_13 = arith.constant 0 : index
    %c0_14 = arith.constant 0 : index
    %13 = vector.load %arg7[%c0_11, %c0_12, %c0_13, %c0_14] : memref<1x1x1x128xf32, #tpu.memory_space<vmem>>, vector<1x1x1x128xf32>
    %14 = vector.shape_cast %13 : vector<1x1x1x128xf32> to vector<1x128xf32>
    %15 = vector.shape_cast %12 : vector<1x128xf32> to vector<1x1x1x128xf32>
    tpu.vector_store %arg7[%c0_11, %c0_12, %c0_13, %c0_14], %15 {strides = array<i32>} : memref<1x1x1x128xf32, #tpu.memory_space<vmem>>, vector<1x1x1x128xf32>,
    %16 = arith.truncf %4 : vector<128x128xf32> to vector<128x128xbf16>
    %c0_15 = arith.constant 0 : index
    %c0_16 = arith.constant 0 : index
    %c0_17 = arith.constant 0 : index
    %17 = vector.load %arg5[%c0_15, %c0_16, %c0_17] : memref<1x128x128xbf16, #tpu.memory_space<vmem>>, vector<1x128x128xbf16>
    %18 = vector.shape_cast %17 : vector<1x128x128xbf16> to vector<128x128xbf16>
    %19 = vector.shape_cast %16 : vector<128x128xbf16> to vector<1x128x128xbf16>
    tpu.vector_store %arg5[%c0_15, %c0_16, %c0_17], %19 {strides = array<i32>} : memref<1x128x128xbf16, #tpu.memory_space<vmem>>, vector<1x128x128xbf16>,
    return
  }
  func.func @transform_0(%arg0: i32, %arg1: i32, %arg2: i32) -> (i32, i32, i32) {
    %c0_i32 = arith.constant 0 : i32
    %c0_i32_0 = arith.constant 0 : i32
    return %arg0, %arg1, %c0_i32 : i32, i32, i32
  }
  func.func @transform_1(%arg0: i32, %arg1: i32, %arg2: i32) -> (i32, i32, i32) {
    %c0_i32 = arith.constant 0 : i32
    %c0_i32_0 = arith.constant 0 : i32
    return %arg0, %c0_i32, %arg2 : i32, i32, i32
  }
  func.func @transform_2(%arg0: i32, %arg1: i32, %arg2: i32) -> (i32, i32, i32) {
    %c0_i32 = arith.constant 0 : i32
    return %arg0, %arg1, %arg2 : i32, i32, i32
  }
  func.func @transform_3(%arg0: i32, %arg1: i32, %arg2: i32) -> (i32, i32, i32, i32) {
    %c0_i32 = arith.constant 0 : i32
    %c0_i32_0 = arith.constant 0 : i32
    return %arg0, %arg1, %c0_i32, %arg2 : i32, i32, i32, i32
  }
  func.func @transform_4(%arg0: i32, %arg1: i32, %arg2: i32) -> (i32, i32, i32, i32) {
    %c0_i32 = arith.constant 0 : i32
    %c0_i32_0 = arith.constant 0 : i32
    return %arg0, %arg1, %c0_i32, %arg2 : i32, i32, i32, i32
  }
}

module attributes {stable_mosaic.version = 11 : i64} {
  func.func @_gemm_bn_kernel(%arg0: i32, %arg1: i32, %arg2: i32, %arg3: memref<1x512x128xbf16, #tpu.memory_space<vmem>>, %arg4: memref<1x128x128xbf16, #tpu.memory_space<vmem>>, %arg5: memref<1x512x128xbf16, #tpu.memory_space<vmem>>, %arg6: memref<1x1x1x128xf32, #tpu.memory_space<vmem>>, %arg7: memref<1x1x1x128xf32, #tpu.memory_space<vmem>>) attributes {dimension_semantics = [#tpu.dimension_semantics<parallel>, #tpu.dimension_semantics<parallel>, #tpu.dimension_semantics<parallel>], iteration_bounds = array<i64: 4, 1, 1>, scalar_prefetch = 0 : i64, scratch_operands = 0 : i64, tpu.core_type = #tpu.core_type<tc>, window_params = [{transform_indices = @transform_0, window_bounds = array<i64: 1, 512, 128>}, {transform_indices = @transform_1, window_bounds = array<i64: 1, 128, 128>}, {transform_indices = @transform_2, window_bounds = array<i64: 1, 512, 128>}, {transform_indices = @transform_3, window_bounds = array<i64: 1, 1, 1, 128>}, {transform_indices = @transform_4, window_bounds = array<i64: 1, 1, 1, 128>}]} {
    %c0 = arith.constant 0 : index
    %c0_0 = arith.constant 0 : index
    %c0_1 = arith.constant 0 : index
    %0 = vector.load %arg3[%c0, %c0_0, %c0_1] : memref<1x512x128xbf16, #tpu.memory_space<vmem>>, vector<1x512x128xbf16>
    %1 = vector.shape_cast %0 : vector<1x512x128xbf16> to vector<512x128xbf16>
    %c0_2 = arith.constant 0 : index
    %c0_3 = arith.constant 0 : index
    %c0_4 = arith.constant 0 : index
    %2 = vector.load %arg4[%c0_2, %c0_3, %c0_4] : memref<1x128x128xbf16, #tpu.memory_space<vmem>>, vector<1x128x128xbf16>
    %3 = vector.shape_cast %2 : vector<1x128x128xbf16> to vector<128x128xbf16>
    %cst = arith.constant dense<0.000000e+00> : vector<512x128xf32>
    %4 = tpu.matmul %1, %3, %cst {dimension_numbers = #tpu.dot_dimension_numbers<[1], [0], [0], [1], [0, 0, 1, 1], [], []>} : vector<512x128xbf16>, vector<128x128xbf16>, vector<512x128xf32> -> vector<512x128xf32>
    %cst_5 = arith.constant dense<0.000000e+00> : vector<128xf32>
    %5 = vector.multi_reduction <add>, %4, %cst_5 [0] : vector<512x128xf32> to vector<128xf32>
    %6 = vector.shape_cast %5 : vector<128xf32> to vector<1x128xf32>
    %c0_6 = arith.constant 0 : index
    %c0_7 = arith.constant 0 : index
    %c0_8 = arith.constant 0 : index
    %c0_9 = arith.constant 0 : index
    %7 = vector.load %arg6[%c0_6, %c0_7, %c0_8, %c0_9] : memref<1x1x1x128xf32, #tpu.memory_space<vmem>>, vector<1x1x1x128xf32>
    %8 = vector.shape_cast %7 : vector<1x1x1x128xf32> to vector<1x128xf32>
    %9 = vector.shape_cast %6 : vector<1x128xf32> to vector<1x1x1x128xf32>
    tpu.vector_store %arg6[%c0_6, %c0_7, %c0_8, %c0_9], %9 {strides = array<i32>} : memref<1x1x1x128xf32, #tpu.memory_space<vmem>>, vector<1x1x1x128xf32>,
    %10 = arith.mulf %4, %4 : vector<512x128xf32>
    %cst_10 = arith.constant dense<0.000000e+00> : vector<128xf32>
    %11 = vector.multi_reduction <add>, %10, %cst_10 [0] : vector<512x128xf32> to vector<128xf32>
    %12 = vector.shape_cast %11 : vector<128xf32> to vector<1x128xf32>
    %c0_11 = arith.constant 0 : index
    %c0_12 = arith.constant 0 : index
    %c0_13 = arith.constant 0 : index
    %c0_14 = arith.constant 0 : index
    %13 = vector.load %arg7[%c0_11, %c0_12, %c0_13, %c0_14] : memref<1x1x1x128xf32, #tpu.memory_space<vmem>>, vector<1x1x1x128xf32>
    %14 = vector.shape_cast %13 : vector<1x1x1x128xf32> to vector<1x128xf32>
    %15 = vector.shape_cast %12 : vector<1x128xf32> to vector<1x1x1x128xf32>
    tpu.vector_store %arg7[%c0_11, %c0_12, %c0_13, %c0_14], %15 {strides = array<i32>} : memref<1x1x1x128xf32, #tpu.memory_space<vmem>>, vector<1x1x1x128xf32>,
    %16 = arith.truncf %4 : vector<512x128xf32> to vector<512x128xbf16>
    %c0_15 = arith.constant 0 : index
    %c0_16 = arith.constant 0 : index
    %c0_17 = arith.constant 0 : index
    %17 = vector.load %arg5[%c0_15, %c0_16, %c0_17] : memref<1x512x128xbf16, #tpu.memory_space<vmem>>, vector<1x512x128xbf16>
    %18 = vector.shape_cast %17 : vector<1x512x128xbf16> to vector<512x128xbf16>
    %19 = vector.shape_cast %16 : vector<512x128xbf16> to vector<1x512x128xbf16>
    tpu.vector_store %arg5[%c0_15, %c0_16, %c0_17], %19 {strides = array<i32>} : memref<1x512x128xbf16, #tpu.memory_space<vmem>>, vector<1x512x128xbf16>,
    return
  }
  func.func @transform_0(%arg0: i32, %arg1: i32, %arg2: i32) -> (i32, i32, i32) {
    %c0_i32 = arith.constant 0 : i32
    %c0_i32_0 = arith.constant 0 : i32
    return %arg0, %arg1, %c0_i32 : i32, i32, i32
  }
  func.func @transform_1(%arg0: i32, %arg1: i32, %arg2: i32) -> (i32, i32, i32) {
    %c0_i32 = arith.constant 0 : i32
    %c0_i32_0 = arith.constant 0 : i32
    return %arg0, %c0_i32, %arg2 : i32, i32, i32
  }
  func.func @transform_2(%arg0: i32, %arg1: i32, %arg2: i32) -> (i32, i32, i32) {
    %c0_i32 = arith.constant 0 : i32
    return %arg0, %arg1, %arg2 : i32, i32, i32
  }
  func.func @transform_3(%arg0: i32, %arg1: i32, %arg2: i32) -> (i32, i32, i32, i32) {
    %c0_i32 = arith.constant 0 : i32
    %c0_i32_0 = arith.constant 0 : i32
    return %arg0, %arg1, %c0_i32, %arg2 : i32, i32, i32, i32
  }
  func.func @transform_4(%arg0: i32, %arg1: i32, %arg2: i32) -> (i32, i32, i32, i32) {
    %c0_i32 = arith.constant 0 : i32
    %c0_i32_0 = arith.constant 0 : i32
    return %arg0, %arg1, %c0_i32, %arg2 : i32, i32, i32, i32
  }
}

module attributes {stable_mosaic.version = 11 : i64} {
  func.func @_gemm_tanh_kernel(%arg0: i32, %arg1: i32, %arg2: i32, %arg3: memref<1x512x128xbf16, #tpu.memory_space<vmem>>, %arg4: memref<1x128x128xbf16, #tpu.memory_space<vmem>>, %arg5: memref<1x512x128xbf16, #tpu.memory_space<vmem>>) attributes {dimension_semantics = [#tpu.dimension_semantics<parallel>, #tpu.dimension_semantics<parallel>, #tpu.dimension_semantics<parallel>], iteration_bounds = array<i64: 4, 4, 1>, scalar_prefetch = 0 : i64, scratch_operands = 0 : i64, tpu.core_type = #tpu.core_type<tc>, window_params = [{transform_indices = @transform_0, window_bounds = array<i64: 1, 512, 128>}, {transform_indices = @transform_1, window_bounds = array<i64: 1, 128, 128>}, {transform_indices = @transform_2, window_bounds = array<i64: 1, 512, 128>}]} {
    %c0 = arith.constant 0 : index
    %c0_0 = arith.constant 0 : index
    %c0_1 = arith.constant 0 : index
    %0 = vector.load %arg3[%c0, %c0_0, %c0_1] : memref<1x512x128xbf16, #tpu.memory_space<vmem>>, vector<1x512x128xbf16>
    %1 = vector.shape_cast %0 : vector<1x512x128xbf16> to vector<512x128xbf16>
    %c0_2 = arith.constant 0 : index
    %c0_3 = arith.constant 0 : index
    %c0_4 = arith.constant 0 : index
    %2 = vector.load %arg4[%c0_2, %c0_3, %c0_4] : memref<1x128x128xbf16, #tpu.memory_space<vmem>>, vector<1x128x128xbf16>
    %3 = vector.shape_cast %2 : vector<1x128x128xbf16> to vector<128x128xbf16>
    %cst = arith.constant dense<0.000000e+00> : vector<512x128xf32>
    %4 = tpu.matmul %1, %3, %cst {dimension_numbers = #tpu.dot_dimension_numbers<[1], [0], [0], [1], [0, 0, 1, 1], [], []>} : vector<512x128xbf16>, vector<128x128xbf16>, vector<512x128xf32> -> vector<512x128xf32>
    %5 = math.tanh %4 : vector<512x128xf32>
    %6 = arith.truncf %5 : vector<512x128xf32> to vector<512x128xbf16>
    %c0_5 = arith.constant 0 : index
    %c0_6 = arith.constant 0 : index
    %c0_7 = arith.constant 0 : index
    %7 = vector.load %arg5[%c0_5, %c0_6, %c0_7] : memref<1x512x128xbf16, #tpu.memory_space<vmem>>, vector<1x512x128xbf16>
    %8 = vector.shape_cast %7 : vector<1x512x128xbf16> to vector<512x128xbf16>
    %9 = vector.shape_cast %6 : vector<512x128xbf16> to vector<1x512x128xbf16>
    tpu.vector_store %arg5[%c0_5, %c0_6, %c0_7], %9 {strides = array<i32>} : memref<1x512x128xbf16, #tpu.memory_space<vmem>>, vector<1x512x128xbf16>,
    return
  }
  func.func @transform_0(%arg0: i32, %arg1: i32, %arg2: i32) -> (i32, i32, i32) {
    %c0_i32 = arith.constant 0 : i32
    %c0_i32_0 = arith.constant 0 : i32
    return %arg0, %arg1, %c0_i32 : i32, i32, i32
  }
  func.func @transform_1(%arg0: i32, %arg1: i32, %arg2: i32) -> (i32, i32, i32) {
    %c0_i32 = arith.constant 0 : i32
    %c0_i32_0 = arith.constant 0 : i32
    return %arg0, %c0_i32, %arg2 : i32, i32, i32
  }
  func.func @transform_2(%arg0: i32, %arg1: i32, %arg2: i32) -> (i32, i32, i32) {
    %c0_i32 = arith.constant 0 : i32
    return %arg0, %arg1, %arg2 : i32, i32, i32
  }
}

</mosaic_0001>

<bundles_post_ra>
// kernel: generator_forward.5
= control target key start
LH: loop header
LB: loop body
LE: loop exit
PB: predicated region body
PF: predicated region fallthrough
CT: control target
= control target key end

     0   :  { %s336_s1 = inlined_call_operand.vmem [shape: bf16[1,128,128], index: 1, kind: input, shape index: {}]   ;;  %s337_s0 = inlined_call_operand.vmem [shape: bf16[1,32,128], index: 0, kind: input, shape index: {}]   ;;  %s338_s2 = inlined_call_operand.vmem [shape: bf16[1,32,128], index: 2, kind: output, shape index: {0}]   ;;  %s339_s3 = inlined_call_operand.vmem [shape: f32[1,1,1,128], index: 3, kind: output, shape index: {1}]   ;;  %s340_s4 = inlined_call_operand.vmem [shape: f32[1,1,1,128], index: 4, kind: output, shape index: {2}]  }
   0x1   :  { %v259_v0 = vld [vmem:[%s336_s1] sm:$0xff]   ;;  %v260_v1 = vld [vmem:[%s336_s1 + $0x8] sm:$0xff]   ;;  %v261_v2 = vld [vmem:[%s336_s1 + $0x10] sm:$0xff]  }
   0x2   :  { %239 = vmatprep.subr.bf16.mxu0 %v259_v0  ;;  %v262_v3 = vld [vmem:[%s336_s1 + $0x18] sm:$0xff]   ;;  %v267_v4 = vld [vmem:[%s337_s0] sm:$0xff]   ;;  %v264_v6 = vld [vmem:[%s336_s1 + $0x28] sm:$0xff]  }
   0x3   :  { %240 = vmatpush3.bf16.msra.mxu0 %v259_v0  ;;  %255 = vmatprep.mubr.bf16.mxu0 %v267_v4  ;;  %v263_v5 = vld [vmem:[%s336_s1 + $0x20] sm:$0xff]   ;;  %v265_v7 = vld [vmem:[%s336_s1 + $0x30] sm:$0xff]   ;;  %v266_v8 = vld [vmem:[%s336_s1 + $0x38] sm:$0xff]  }
   0x4   :  { %241 = vmatprep.subr.bf16.mxu0 %v260_v1  ;;  %v268_v9 = vld [vmem:[%s337_s0 + $0x8] sm:$0xff]  }
   0x7   :  { %242 = vmatpush3.bf16.msra.mxu0 %v260_v1 }
   0x8   :  { %243 = vmatprep.subr.bf16.mxu0 %v261_v2 }
   0xb   :  { %244 = vmatpush3.bf16.msra.mxu0 %v261_v2 }
   0xc   :  { %245 = vmatprep.subr.bf16.mxu0 %v262_v3 }
   0xf   :  { %246 = vmatpush3.bf16.msra.mxu0 %v262_v3 }
  0x10   :  { %247 = vmatprep.subr.bf16.mxu0 %v263_v5 }
  0x13   :  { %248 = vmatpush3.bf16.msra.mxu0 %v263_v5 }
  0x14   :  { %249 = vmatprep.subr.bf16.mxu0 %v264_v6 }
  0x17   :  { %250 = vmatpush3.bf16.msra.mxu0 %v264_v6 }
  0x18   :  { %251 = vmatprep.subr.bf16.mxu0 %v265_v7 }
  0x1b   :  { %252 = vmatpush3.bf16.msra.mxu0 %v265_v7 }
  0x1c   :  { %253 = vmatprep.subr.bf16.mxu0 %v266_v8 }
  0x1f   :  { %254 = vmatpush3.bf16.msra.mxu0 %v266_v8 }
  0x22   :  { %256 = vmatmul.mubr.bf16.vlgmr.msra.gmra.mrb[0].mxu0 %v268_v9 }
  0xf5   :  { %v257_v10 = vpop.f32.mrb[0].mxu0 }
  0xf6   :  { %v129_v11 = vpop.f32.mrb[1].mxu0  ;;  %v156_v19 = vmul.f32 %v257_v10, %v257_v10 }
  0xf7   :  { %v258_v12 = vpop.f32.mrb[2].mxu0  ;;  %v154_v15 = vmul.f32 %v129_v11, %v129_v11 }
  0xf8   :  { %v226_v13 = vpack.c.bf16 %v258_v12, %v257_v10  ;;  %v132_v14 = vpop.f32.mrb[3].mxu0  ;;  %v157_v22 = vmul.f32 %v258_v12, %v258_v12 }
  0xf9   :  { %v144_v16 = vadd.f32 %v132_v14, %v129_v11  ;;  %v155_v17 = vmul.f32 %v132_v14, %v132_v14  ;;  %v221_v18 = vpack.c.bf16 %v132_v14, %v129_v11 }
  0xfa   :  { %228 = vst [vmem:[%s338_s2 + $0x8] sm:$0xff] %v226_v13  }
  0xfb   :  { %v145_v20 = vadd.f32 %v257_v10, %v144_v16  ;;  %v158_v21 = vadd.f32 %v155_v17, %v154_v15  ;;  %222 = vst [vmem:[%s338_s2] sm:$0xff] %v221_v18  }
  0xfd   :  { %v146_v23 = vadd.f32 %v258_v12, %v145_v20  ;;  %v159_v24 = vadd.f32 %v158_v21, %v156_v19 }
  0xff   :  { %v147_v25 = vrot.slane %v146_v23, 4  ;;  %v160_v26 = vadd.f32 %v159_v24, %v157_v22 }
 0x101   :  { %v148_v27 = vadd.f32 %v147_v25, %v146_v23  ;;  %v161_v28 = vrot.slane %v160_v26, 4 }
 0x103   :  { %v149_v29 = vrot.slane %v148_v27, 2  ;;  %v162_v30 = vadd.f32 %v161_v28, %v160_v26 }
 0x105   :  { %v150_v31 = vadd.f32 %v149_v29, %v148_v27  ;;  %v163_v32 = vrot.slane %v162_v30, 2 }
 0x107   :  { %v151_v33 = vrot.slane %v150_v31, 1  ;;  %v164_v34 = vadd.f32 %v163_v32, %v162_v30 }
 0x109   :  { %v152_v35 = vadd.f32 %v151_v33, %v150_v31  ;;  %v165_v36 = vrot.slane %v164_v34, 1 }
 0x10b   :  { %153 = vst [vmem:[%s339_s3] sm:$0x1] %v152_v35  ;;  %v166_v37 = vadd.f32 %v165_v36, %v164_v34 }
 0x10d   :  { %167 = vst [vmem:[%s340_s4] sm:$0x1] %v166_v37 }

// kernel: generator_forward.6
= control target key start
LH: loop header
LB: loop body
LE: loop exit
PB: predicated region body
PF: predicated region fallthrough
CT: control target
= control target key end

     0   :  { %s986_s15 = smov 0   ;;  %s988_s16 = smov 0   ;;  %s1053_s0 = inlined_call_operand.vmem [shape: bf16[4,32,256], index: 0, kind: input, shape index: {}]   ;;  %s1054_s1 = inlined_call_operand.vmem [shape: bf16[4,256,128], index: 1, kind: input, shape index: {}]   ;;  %s1055_s2 = inlined_call_operand.vmem [shape: bf16[4,32,128], index: 2, kind: output, shape index: {0}]   ;;  %s1056_s3 = inlined_call_operand.vmem [shape: f32[4,1,1,128], index: 3, kind: output, shape index: {1}]   ;;  %s1057_s4 = inlined_call_operand.vmem [shape: f32[4,1,1,128], index: 4, kind: output, shape index: {2}]  }
   0x1   :  { %s990_s17 = smov 0  }
   0x2 LB: > { %s34_s18 = sadd.s32 1, %s955_s16  ;;  %p796_p0 = scmp.ge.s32.totalorder %s959_s17, 1  ;;  %s959_s17 = sphi %s990_s17, %s15_s17   ;;  %s955_s16 = sphi %s988_s16, %s1059_s16   ;;  %s951_s15 = sphi %s986_s15, %s1058_s15  }
   0x3   : > { %p36_p1 = scmp.ge.s32.totalorder %s34_s18, 4  ;;  %p221_p2 = scmp.lt.s32.totalorder %s959_s17, 5 }
   0x5   : > { %s1061_s18 = smov (%p36_p1, %s34_s18), 0  ;;  %p222_p3 = pnand %p796_p0, %p221_p2 }
   0x6   : > { %p286_p4 = scmp.lt.s32.totalorder (!%p222_p3), %s951_s15, 3 }
   0x7   : > { %225 = sbr.rel (%p222_p3) target bundleno = 288 (0x120), region = 28 }
   0xe   : > { %s1063_s15 = smov (!%p286_p4, %s951_s15), 3 }
   0xf   : > { %s830_s19 = sshll.u32 %s1063_s15, 7  ;;  %s829_s23 = sshll.u32 %s1063_s15, 5 }
  0x10   : > { %s1010_s22 = scalar_lea.vmem %s1054_s1, %s830_s19  ;;  %s294_s26 = scalar_lea.vmem %s1053_s0, %s829_s23 }
  0x11   : > { %v915_v0 = vld [vmem:[%s1010_s22 + $0x40] sm:$0xff]   ;;  %v917_v2 = vld [vmem:[%s1010_s22 + $0x48] sm:$0xff]   ;;  %v919_v4 = vld [vmem:[%s1010_s22 + $0x50] sm:$0xff]   ;;  %s831_s27 = sshll.u32 %s1063_s15, 4  ;;  %s325_s7 = scalar_lea.vmem %s1056_s3, %s1063_s15 }
  0x12   : > { %v916_v1 = vld [vmem:[%s1010_s22] sm:$0xff]   ;;  %847 = vmatprep.subr.bf16.mxu0 %v915_v0  ;;  %875 = vmatprep.subr.bf16.mxu1 %v915_v0  ;;  %v918_v3 = vld [vmem:[%s1010_s22 + $0x8] sm:$0xff]   ;;  %v920_v5 = vld [vmem:[%s1010_s22 + $0x10] sm:$0xff]   ;;  %s315_s30 = scalar_lea.vmem %s1055_s2, %s831_s27  ;;  %s334_s10 = scalar_lea.vmem %s1057_s4, %s1063_s15 }
  0x13   : > { %848 = vmatpush3.bf16.msra.mxu0 %v916_v1  ;;  %883 = vmatpush3.bf16.msra.mxu1 %v916_v1  ;;  %v921_v6 = vld [vmem:[%s1010_s22 + $0x58] sm:$0xff]   ;;  %v923_v8 = vld [vmem:[%s1010_s22 + $0x60] sm:$0xff]   ;;  %v925_v10 = vld [vmem:[%s1010_s22 + $0x68] sm:$0xff]  }
  0x14   : > { %849 = vmatprep.subr.bf16.mxu0 %v917_v2  ;;  %876 = vmatprep.subr.bf16.mxu1 %v917_v2  ;;  %v922_v7 = vld [vmem:[%s1010_s22 + $0x18] sm:$0xff]   ;;  %v924_v9 = vld [vmem:[%s1010_s22 + $0x20] sm:$0xff]   ;;  %v926_v13 = vld [vmem:[%s1010_s22 + $0x28] sm:$0xff]  }
  0x15   : > { %v933_v11 = vld [vmem:[%s294_s26 + $0x4] ss:$8 sps:$4 sm:$0xff]   ;;  %v936_v12 = vld [vmem:[%s294_s26 + $0x14] ss:$8 sps:$4 sm:$0xff]   ;;  %v931_v18 = vld [vmem:[%s294_s26] ss:$8 sps:$4 sm:$0xff]  }
  0x16   : > { %v927_v14 = vld [vmem:[%s1010_s22 + $0x70] sm:$0xff]   ;;  %520 = vmatprep.mubr.bf16.mxu0 %v933_v11  ;;  %528 = vmatprep.mubr.bf16.mxu1 %v936_v12  ;;  %v929_v16 = vld [vmem:[%s1010_s22 + $0x78] sm:$0xff]  }
  0x17   : > { %850 = vmatpush3.bf16.msra.mxu0 %v918_v3  ;;  %884 = vmatpush3.bf16.msra.mxu1 %v918_v3  ;;  %v928_v15 = vld [vmem:[%s1010_s22 + $0x30] sm:$0xff]   ;;  %v930_v17 = vld [vmem:[%s1010_s22 + $0x38] sm:$0xff]  }
  0x18   : > { %851 = vmatprep.subr.bf16.mxu0 %v919_v4  ;;  %877 = vmatprep.subr.bf16.mxu1 %v919_v4  ;;  %v934_v19 = vld [vmem:[%s294_s26 + $0x10] ss:$8 sps:$4 sm:$0xff]  }
  0x1b   : > { %852 = vmatpush3.bf16.msra.mxu0 %v920_v5  ;;  %885 = vmatpush3.bf16.msra.mxu1 %v920_v5 }
  0x1c   : > { %853 = vmatprep.subr.bf16.mxu0 %v921_v6  ;;  %878 = vmatprep.subr.bf16.mxu1 %v921_v6 }
  0x1f   : > { %854 = vmatpush3.bf16.msra.mxu0 %v922_v7  ;;  %886 = vmatpush3.bf16.msra.mxu1 %v922_v7 }
  0x20   : > { %855 = vmatprep.subr.bf16.mxu0 %v923_v8  ;;  %879 = vmatprep.subr.bf16.mxu1 %v923_v8 }
  0x23   : > { %856 = vmatpush3.bf16.msra.mxu0 %v924_v9  ;;  %887 = vmatpush3.bf16.msra.mxu1 %v924_v9 }
  0x24   : > { %857 = vmatprep.subr.bf16.mxu0 %v925_v10  ;;  %880 = vmatprep.subr.bf16.mxu1 %v925_v10 }
  0x27   : > { %858 = vmatpush3.bf16.msra.mxu0 %v926_v13  ;;  %888 = vmatpush3.bf16.msra.mxu1 %v926_v13 }
  0x28   : > { %859 = vmatprep.subr.bf16.mxu0 %v927_v14  ;;  %881 = vmatprep.subr.bf16.mxu1 %v927_v14 }
  0x2b   : > { %860 = vmatpush3.bf16.msra.mxu0 %v928_v15  ;;  %889 = vmatpush3.bf16.msra.mxu1 %v928_v15 }
  0x2c   : > { %861 = vmatprep.subr.bf16.mxu0 %v929_v16  ;;  %882 = vmatprep.subr.bf16.mxu1 %v929_v16 }
  0x2f   : > { %862 = vmatpush3.bf16.msra.mxu0 %v930_v17  ;;  %890 = vmatpush3.bf16.msra.mxu1 %v930_v17 }
  0x32   : > { %521 = vmatmul.mubr.bf16.vlgmr.msra.gmra.mrb[0].mxu0 %v931_v18  ;;  %529 = vmatmul.mubr.bf16.vlgmr.msra.gmra.mrb[0].mxu1 %v934_v19 }
 0x105   : > { %v863_v20 = vpop.f32.mrb[0].mxu0  ;;  %v869_v21 = vpop.f32.mrb[0].mxu1 }
 0x106   : > { %v864_v22 = vpop.f32.mrb[1].mxu0  ;;  %v870_v23 = vpop.f32.mrb[1].mxu1 }
 0x107   : > { %v865_v24 = vadd.f32 %v864_v22, %v863_v20  ;;  %v866_v25 = vpop.f32.mrb[2].mxu0  ;;  %v871_v26 = vadd.f32 %v870_v23, %v869_v21  ;;  %v872_v27 = vpop.f32.mrb[2].mxu1 }
 0x108   : > { %v867_v28 = vpop.f32.mrb[3].mxu0  ;;  %v873_v29 = vpop.f32.mrb[3].mxu1 }
 0x109   : > { %v868_v30 = vadd.f32 %v867_v28, %v866_v25  ;;  %v874_v31 = vadd.f32 %v873_v29, %v872_v27  ;;  %v547_v32 = vmul.f32 %v865_v24, %v865_v24  ;;  %v549_v33 = vmul.f32 %v871_v26, %v871_v26 }
 0x10b   : > { %v537_v34 = vadd.f32 %v868_v30, %v865_v24  ;;  %v548_v35 = vmul.f32 %v868_v30, %v868_v30  ;;  %v839_v36 = vpack.c.bf16 %v868_v30, %v865_v24  ;;  %v844_v37 = vpack.c.bf16 %v874_v31, %v871_v26 }
 0x10c   : > { %v550_v41 = vmul.f32 %v874_v31, %v874_v31 }
 0x10d   : > { %v551_v38 = vadd.f32 %v548_v35, %v547_v32  ;;  %840 = vst [vmem:[%s315_s30] sm:$0xff] %v839_v36   ;;  %v538_v39 = vadd.f32 %v871_v26, %v537_v34  ;;  %846 = vst [vmem:[%s315_s30 + $0x8] sm:$0xff] %v844_v37  }
 0x10f   : > { %v539_v40 = vadd.f32 %v874_v31, %v538_v39  ;;  %v552_v42 = vadd.f32 %v551_v38, %v549_v33 }
 0x111   : > { %v540_v43 = vrot.slane %v539_v40, 4  ;;  %v553_v44 = vadd.f32 %v552_v42, %v550_v41 }
 0x113   : > { %v541_v45 = vadd.f32 %v540_v43, %v539_v40  ;;  %v554_v46 = vrot.slane %v553_v44, 4 }
 0x115   : > { %v542_v47 = vrot.slane %v541_v45, 2  ;;  %v555_v48 = vadd.f32 %v554_v46, %v553_v44 }
 0x117   : > { %v543_v49 = vadd.f32 %v542_v47, %v541_v45  ;;  %v556_v50 = vrot.slane %v555_v48, 2 }
 0x119   : > { %v544_v51 = vrot.slane %v543_v49, 1  ;;  %v557_v52 = vadd.f32 %v556_v50, %v555_v48 }
 0x11b   : > { %v545_v53 = vadd.f32 %v544_v51, %v543_v49  ;;  %v558_v54 = vrot.slane %v557_v52, 1 }
 0x11d   : > { %546 = vst [vmem:[%s325_s7] sm:$0x1] %v545_v53  ;;  %v559_v55 = vadd.f32 %v558_v54, %v557_v52 }
 0x11f   : > { %560 = vst [vmem:[%s334_s10] sm:$0x1] %v559_v55 }
 0x120 PF: > { %s15_s17 = sadd.s32 1, %s959_s17   ;;  %s1058_s15 = smov %s955_s16 }
 0x121   : > { %p12_p5 = scmp.ge.s32.totalorder %s15_s17, 6   ;;  %s1059_s16 = smov %s1061_s18 }
 0x123   :  { %14 = sbr.rel (!%p12_p5) target bundleno = 2 (0x2), region = 85 }

// kernel: generator_forward.7
= control target key start
LH: loop header
LB: loop body
LE: loop exit
PB: predicated region body
PF: predicated region fallthrough
CT: control target
= control target key end

     0   :  { %s1170_s15 = smov 0   ;;  %s1172_s16 = smov 0   ;;  %s1252_s0 = inlined_call_operand.vmem [shape: bf16[4,128,128], index: 0, kind: input, shape index: {}]   ;;  %s1253_s1 = inlined_call_operand.vmem [shape: bf16[4,128,128], index: 1, kind: input, shape index: {}]   ;;  %s1254_s2 = inlined_call_operand.vmem [shape: bf16[4,128,128], index: 2, kind: output, shape index: {0}]   ;;  %s1255_s3 = inlined_call_operand.vmem [shape: f32[4,1,1,128], index: 3, kind: output, shape index: {1}]   ;;  %s1256_s4 = inlined_call_operand.vmem [shape: f32[4,1,1,128], index: 4, kind: output, shape index: {2}]  }
   0x1   :  { %s1174_s17 = smov 0  }
   0x2 LB: > { %s34_s18 = sadd.s32 1, %s1139_s16  ;;  %p910_p0 = scmp.ge.s32.totalorder %s1143_s17, 1  ;;  %s1143_s17 = sphi %s1174_s17, %s15_s17   ;;  %s1139_s16 = sphi %s1172_s16, %s1258_s16   ;;  %s1135_s15 = sphi %s1170_s15, %s1257_s15  }
   0x3   : > { %p36_p1 = scmp.ge.s32.totalorder %s34_s18, 4  ;;  %p220_p2 = scmp.lt.s32.totalorder %s1143_s17, 5 }
   0x5   : > { %s1260_s18 = smov (%p36_p1, %s34_s18), 0  ;;  %p221_p3 = pnand %p910_p0, %p220_p2 }
   0x6   : > { %p284_p4 = scmp.lt.s32.totalorder (!%p221_p3), %s1135_s15, 3 }
   0x7   : > { %224 = sbr.rel (%p221_p3) target bundleno = 310 (0x136), region = 28 }
   0xe   : > { %s1262_s15 = smov (!%p284_p4, %s1135_s15), 3 }
   0xf   : > { %s1191_s19 = sshll.u32 %s1262_s15, 6  ;;  %s322_s5 = scalar_lea.vmem %s1255_s3, %s1262_s15 }
  0x10   : > { %s1197_s22 = scalar_lea.vmem %s1253_s1, %s1191_s19  ;;  %s1206_s25 = scalar_lea.vmem %s1252_s0, %s1191_s19 }
  0x11   : > { %v1105_v0 = vld [vmem:[%s1197_s22] sm:$0xff]   ;;  %v1106_v1 = vld [vmem:[%s1197_s22 + $0x8] sm:$0xff]   ;;  %v1107_v2 = vld [vmem:[%s1197_s22 + $0x10] sm:$0xff]   ;;  %s1225_s28 = scalar_lea.vmem %s1254_s2, %s1191_s19  ;;  %s331_s8 = scalar_lea.vmem %s1256_s4, %s1262_s15 }
  0x12   : > { %1033 = vmatprep.subr.bf16.mxu0 %v1105_v0  ;;  %1065 = vmatprep.subr.bf16.mxu1 %v1105_v0  ;;  %v1108_v3 = vld [vmem:[%s1197_s22 + $0x18] sm:$0xff]   ;;  %v1113_v4 = vld [vmem:[%s1206_s25] sm:$0xff]   ;;  %v1110_v7 = vld [vmem:[%s1197_s22 + $0x28] sm:$0xff]  }
  0x13   : > { %1034 = vmatpush3.bf16.msra.mxu0 %v1105_v0  ;;  %1073 = vmatpush3.bf16.msra.mxu1 %v1105_v0  ;;  %v1109_v5 = vld [vmem:[%s1197_s22 + $0x20] sm:$0xff]   ;;  %v1111_v8 = vld [vmem:[%s1197_s22 + $0x30] sm:$0xff]   ;;  %v1112_v9 = vld [vmem:[%s1197_s22 + $0x38] sm:$0xff]  }
  0x14   : > { %1035 = vmatprep.subr.bf16.mxu0 %v1106_v1  ;;  %1066 = vmatprep.subr.bf16.mxu1 %v1106_v1  ;;  %v1117_v6 = vld [vmem:[%s1206_s25 + $0x20] sm:$0xff]   ;;  %v1114_v10 = vld [vmem:[%s1206_s25 + $0x8] sm:$0xff]   ;;  %v1115_v12 = vld [vmem:[%s1206_s25 + $0x10] sm:$0xff]  }
  0x15   : > { %1049 = vmatprep.mubr.bf16.mxu0 %v1113_v4  ;;  %1057 = vmatprep.mubr.bf16.mxu1 %v1117_v6  ;;  %v1118_v11 = vld [vmem:[%s1206_s25 + $0x28] sm:$0xff]   ;;  %v1119_v13 = vld [vmem:[%s1206_s25 + $0x30] sm:$0xff]   ;;  %v1116_v14 = vld [vmem:[%s1206_s25 + $0x18] sm:$0xff]  }
  0x16   : > { %v1120_v15 = vld [vmem:[%s1206_s25 + $0x38] sm:$0xff]  }
  0x17   : > { %1036 = vmatpush3.bf16.msra.mxu0 %v1106_v1  ;;  %1074 = vmatpush3.bf16.msra.mxu1 %v1106_v1 }
  0x18   : > { %1037 = vmatprep.subr.bf16.mxu0 %v1107_v2  ;;  %1067 = vmatprep.subr.bf16.mxu1 %v1107_v2 }
  0x1b   : > { %1038 = vmatpush3.bf16.msra.mxu0 %v1107_v2  ;;  %1075 = vmatpush3.bf16.msra.mxu1 %v1107_v2 }
  0x1c   : > { %1039 = vmatprep.subr.bf16.mxu0 %v1108_v3  ;;  %1068 = vmatprep.subr.bf16.mxu1 %v1108_v3 }
  0x1f   : > { %1040 = vmatpush3.bf16.msra.mxu0 %v1108_v3  ;;  %1076 = vmatpush3.bf16.msra.mxu1 %v1108_v3 }
  0x20   : > { %1041 = vmatprep.subr.bf16.mxu0 %v1109_v5  ;;  %1069 = vmatprep.subr.bf16.mxu1 %v1109_v5 }
  0x23   : > { %1042 = vmatpush3.bf16.msra.mxu0 %v1109_v5  ;;  %1077 = vmatpush3.bf16.msra.mxu1 %v1109_v5 }
  0x24   : > { %1043 = vmatprep.subr.bf16.mxu0 %v1110_v7  ;;  %1070 = vmatprep.subr.bf16.mxu1 %v1110_v7 }
  0x27   : > { %1044 = vmatpush3.bf16.msra.mxu0 %v1110_v7  ;;  %1078 = vmatpush3.bf16.msra.mxu1 %v1110_v7 }
  0x28   : > { %1045 = vmatprep.subr.bf16.mxu0 %v1111_v8  ;;  %1071 = vmatprep.subr.bf16.mxu1 %v1111_v8 }
  0x2b   : > { %1046 = vmatpush3.bf16.msra.mxu0 %v1111_v8  ;;  %1079 = vmatpush3.bf16.msra.mxu1 %v1111_v8 }
  0x2c   : > { %1047 = vmatprep.subr.bf16.mxu0 %v1112_v9  ;;  %1072 = vmatprep.subr.bf16.mxu1 %v1112_v9 }
  0x2f   : > { %1048 = vmatpush3.bf16.msra.mxu0 %v1112_v9  ;;  %1080 = vmatpush3.bf16.msra.mxu1 %v1112_v9 }
  0x32   : > { %1050 = vmatmul.mubr.bf16.vlgmr.msra.gmra.mrb[0].mxu0 %v1114_v10  ;;  %1058 = vmatmul.mubr.bf16.vlgmr.msra.gmra.mrb[0].mxu1 %v1118_v11 }
  0x33   : > { %1053 = vmatprep.mubr.bf16.mxu0 %v1115_v12  ;;  %1061 = vmatprep.mubr.bf16.mxu1 %v1119_v13 }
  0x3a   : > { %1054 = vmatmul.mubr.bf16.gmra.mrb[4].mxu0 %v1116_v14  ;;  %1062 = vmatmul.mubr.bf16.gmra.mrb[4].mxu1 %v1120_v15 }
 0x105   : > { %v1051_v16 = vpop.f32.mrb[0].mxu0  ;;  %v1059_v17 = vpop.f32.mrb[0].mxu1 }
 0x106   : > { %v495_v18 = vpop.f32.mrb[1].mxu0  ;;  %v527_v19 = vpop.f32.mrb[1].mxu1  ;;  %v582_v31 = vmul.f32 %v1051_v16, %v1051_v16  ;;  %v590_v3 = vmul.f32 %v1059_v17, %v1059_v17 }
 0x107   : > { %v1052_v20 = vpop.f32.mrb[2].mxu0  ;;  %v1060_v21 = vpop.f32.mrb[2].mxu1  ;;  %v580_v26 = vmul.f32 %v495_v18, %v495_v18  ;;  %v588_v61 = vmul.f32 %v527_v19, %v527_v19 }
 0x108   : > { %v978_v22 = vpack.c.bf16 %v1052_v20, %v1051_v16  ;;  %v498_v23 = vpop.f32.mrb[3].mxu0  ;;  %v998_v24 = vpack.c.bf16 %v1060_v21, %v1059_v17  ;;  %v530_v25 = vpop.f32.mrb[3].mxu1  ;;  %v583_v34 = vmul.f32 %v1052_v20, %v1052_v20  ;;  %v591_v6 = vmul.f32 %v1060_v21, %v1060_v21 }
 0x109   : > { %v558_v27 = vadd.f32 %v498_v23, %v495_v18  ;;  %v581_v28 = vmul.f32 %v498_v23, %v498_v23  ;;  %v973_v29 = vpack.c.bf16 %v498_v23, %v495_v18  ;;  %v993_v30 = vpack.c.bf16 %v530_v25, %v527_v19 }
 0x10a   : > { %1010 = vst [vmem:[%s1225_s28 + $0x8] sm:$0xff] %v978_v22   ;;  %1014 = vst [vmem:[%s1225_s28 + $0x28] sm:$0xff] %v998_v24   ;;  %v589_v2 = vmul.f32 %v530_v25, %v530_v25 }
 0x10b   : > { %v559_v32 = vadd.f32 %v1051_v16, %v558_v27  ;;  %v596_v33 = vadd.f32 %v581_v28, %v580_v26  ;;  %974 = vst [vmem:[%s1225_s28] sm:$0xff] %v973_v29   ;;  %1013 = vst [vmem:[%s1225_s28 + $0x20] sm:$0xff] %v993_v30  }
 0x10d   : > { %v597_v35 = vadd.f32 %v596_v33, %v582_v31  ;;  %v1055_v36 = vpop.f32.mrb[4].mxu0  ;;  %v560_v37 = vadd.f32 %v1052_v20, %v559_v32  ;;  %v1063_v38 = vpop.f32.mrb[4].mxu1 }
 0x10e   : > { %v511_v39 = vpop.f32.mrb[5].mxu0  ;;  %v543_v40 = vpop.f32.mrb[5].mxu1  ;;  %v586_v55 = vmul.f32 %v1055_v36, %v1055_v36  ;;  %v594_v15 = vmul.f32 %v1063_v38, %v1063_v38 }
 0x10f   : > { %v561_v41 = vadd.f32 %v560_v37, %v511_v39  ;;  %v584_v42 = vmul.f32 %v511_v39, %v511_v39  ;;  %v598_v43 = vadd.f32 %v597_v35, %v583_v34  ;;  %v1056_v44 = vpop.f32.mrb[6].mxu0  ;;  %v1064_v45 = vpop.f32.mrb[6].mxu1  ;;  %v592_v9 = vmul.f32 %v543_v40, %v543_v40 }
 0x110   : > { %v988_v46 = vpack.c.bf16 %v1056_v44, %v1055_v36  ;;  %v514_v47 = vpop.f32.mrb[7].mxu0  ;;  %v1008_v48 = vpack.c.bf16 %v1064_v45, %v1063_v38  ;;  %v546_v49 = vpop.f32.mrb[7].mxu1  ;;  %v587_v58 = vmul.f32 %v1056_v44, %v1056_v44 }
 0x111   : > { %v599_v50 = vadd.f32 %v598_v43, %v584_v42  ;;  %v562_v51 = vadd.f32 %v561_v41, %v514_v47  ;;  %v585_v52 = vmul.f32 %v514_v47, %v514_v47  ;;  %v983_v53 = vpack.c.bf16 %v514_v47, %v511_v39 }
 0x112   : > { %1012 = vst [vmem:[%s1225_s28 + $0x18] sm:$0xff] %v988_v46   ;;  %1016 = vst [vmem:[%s1225_s28 + $0x38] sm:$0xff] %v1008_v48   ;;  %v1003_v54 = vpack.c.bf16 %v546_v49, %v543_v40  ;;  %v593_v14 = vmul.f32 %v546_v49, %v546_v49 }
 0x113   : > { %v563_v56 = vadd.f32 %v1055_v36, %v562_v51  ;;  %v600_v57 = vadd.f32 %v599_v50, %v585_v52  ;;  %1011 = vst [vmem:[%s1225_s28 + $0x10] sm:$0xff] %v983_v53  }
 0x114   : > { %1015 = vst [vmem:[%s1225_s28 + $0x30] sm:$0xff] %v1003_v54  }
 0x115   : > { %v601_v59 = vadd.f32 %v600_v57, %v586_v55  ;;  %v564_v60 = vadd.f32 %v1056_v44, %v563_v56 }
 0x117   : > { %v565_v62 = vadd.f32 %v564_v60, %v527_v19  ;;  %v602_v63 = vadd.f32 %v601_v59, %v587_v58  ;;  %v595_v19 = vmul.f32 %v1064_v45, %v1064_v45 }
 0x119   : > { %v603_v0 = vadd.f32 %v602_v63, %v588_v61  ;;  %v566_v1 = vadd.f32 %v565_v62, %v530_v25 }
 0x11b   : > { %v567_v4 = vadd.f32 %v1059_v17, %v566_v1  ;;  %v604_v5 = vadd.f32 %v603_v0, %v589_v2 }
 0x11d   : > { %v605_v7 = vadd.f32 %v604_v5, %v590_v3  ;;  %v568_v8 = vadd.f32 %v1060_v21, %v567_v4 }
 0x11f   : > { %v569_v10 = vadd.f32 %v568_v8, %v543_v40  ;;  %v606_v11 = vadd.f32 %v605_v7, %v591_v6 }
 0x121   : > { %v607_v12 = vadd.f32 %v606_v11, %v592_v9  ;;  %v570_v13 = vadd.f32 %v569_v10, %v546_v49 }
 0x123   : > { %v571_v16 = vadd.f32 %v1063_v38, %v570_v13  ;;  %v608_v18 = vadd.f32 %v607_v12, %v593_v14 }
 0x125   : > { %v572_v20 = vadd.f32 %v1064_v45, %v571_v16  ;;  %v609_v22 = vadd.f32 %v608_v18, %v594_v15 }
 0x127   : > { %v573_v23 = vrot.slane %v572_v20, 4  ;;  %v610_v17 = vadd.f32 %v609_v22, %v595_v19 }
 0x129   : > { %v574_v24 = vadd.f32 %v573_v23, %v572_v20  ;;  %v611_v25 = vrot.slane %v610_v17, 4 }
 0x12b   : > { %v575_v26 = vrot.slane %v574_v24, 2  ;;  %v612_v21 = vadd.f32 %v611_v25, %v610_v17 }
 0x12d   : > { %v576_v27 = vadd.f32 %v575_v26, %v574_v24  ;;  %v613_v28 = vrot.slane %v612_v21, 2 }
 0x12f   : > { %v577_v29 = vrot.slane %v576_v27, 1  ;;  %v614_v30 = vadd.f32 %v613_v28, %v612_v21 }
 0x131   : > { %v578_v31 = vadd.f32 %v577_v29, %v576_v27  ;;  %v615_v32 = vrot.slane %v614_v30, 1 }
 0x133   : > { %579 = vst [vmem:[%s322_s5] sm:$0x1] %v578_v31  ;;  %v616_v33 = vadd.f32 %v615_v32, %v614_v30 }
 0x135   : > { %617 = vst [vmem:[%s331_s8] sm:$0x1] %v616_v33 }
 0x136 PF: > { %s15_s17 = sadd.s32 1, %s1143_s17   ;;  %s1257_s15 = smov %s1139_s16 }
 0x137   : > { %p12_p5 = scmp.ge.s32.totalorder %s15_s17, 6   ;;  %s1258_s16 = smov %s1260_s18 }
 0x139   :  { %14 = sbr.rel (!%p12_p5) target bundleno = 2 (0x2), region = 85 }

// kernel: generator_forward.8
= control target key start
LH: loop header
LB: loop body
LE: loop exit
PB: predicated region body
PF: predicated region fallthrough
CT: control target
= control target key end

     0   :  { %s2298_s15 = smov 0   ;;  %s2300_s16 = smov 0   ;;  %s2620_s0 = inlined_call_operand.vmem [shape: bf16[4,512,128], index: 0, kind: input, shape index: {}]   ;;  %s2621_s1 = inlined_call_operand.vmem [shape: bf16[4,128,128], index: 1, kind: input, shape index: {}]   ;;  %s2622_s2 = inlined_call_operand.vmem [shape: bf16[4,512,128], index: 2, kind: output, shape index: {0}]   ;;  %s2623_s3 = inlined_call_operand.vmem [shape: f32[4,1,1,128], index: 3, kind: output, shape index: {1}]   ;;  %s2624_s4 = inlined_call_operand.vmem [shape: f32[4,1,1,128], index: 4, kind: output, shape index: {2}]  }
   0x1   :  { %s2302_s17 = smov 0  }
   0x2 LB: > { %s34_s18 = sadd.s32 1, %s2267_s16  ;;  %p1678_p0 = scmp.ge.s32.totalorder %s2271_s17, 1  ;;  %s2271_s17 = sphi %s2302_s17, %s15_s17   ;;  %s2267_s16 = sphi %s2300_s16, %s2626_s16   ;;  %s2263_s15 = sphi %s2298_s15, %s2625_s15  }
   0x3   : > { %p36_p1 = scmp.ge.s32.totalorder %s34_s18, 4  ;;  %p220_p2 = scmp.lt.s32.totalorder %s2271_s17, 5 }
   0x5   : > { %s2628_s18 = smov (%p36_p1, %s34_s18), 0  ;;  %p221_p3 = pnand %p1678_p0, %p220_p2 }
   0x6   : > { %p284_p4 = scmp.lt.s32.totalorder (!%p221_p3), %s2263_s15, 3 }
   0x7   : > { %224 = sbr.rel (%p221_p3) target bundleno = 406 (0x196), region = 28 }
   0xe   : > { %s2630_s15 = smov (!%p284_p4, %s2263_s15), 3 }
   0xf   : > { %s1792_s19 = sshll.u32 %s2630_s15, 6  ;;  %s1791_s23 = sshll.u32 %s2630_s15, 8 }
  0x10   : > { %s2322_s22 = scalar_lea.vmem %s2621_s1, %s1792_s19  ;;  %s2333_s26 = scalar_lea.vmem %s2620_s0, %s1791_s23 }
  0x11   : > { %v2209_v0 = vld [vmem:[%s2322_s22] sm:$0xff]   ;;  %v2210_v1 = vld [vmem:[%s2322_s22 + $0x8] sm:$0xff]   ;;  %v2211_v2 = vld [vmem:[%s2322_s22 + $0x10] sm:$0xff]   ;;  %s2381_s29 = scalar_lea.vmem %s2622_s2, %s1791_s23  ;;  %s322_s6 = scalar_lea.vmem %s2623_s3, %s2630_s15 }
  0x12   : > { %2089 = vmatprep.subr.bf16.mxu0 %v2209_v0  ;;  %2169 = vmatprep.subr.bf16.mxu1 %v2209_v0  ;;  %v2212_v3 = vld [vmem:[%s2322_s22 + $0x18] sm:$0xff]   ;;  %v2217_v4 = vld [vmem:[%s2333_s26] sm:$0xff]   ;;  %v2214_v6 = vld [vmem:[%s2322_s22 + $0x28] sm:$0xff]   ;;  %s331_s9 = scalar_lea.vmem %s2624_s4, %s2630_s15 }
  0x13   : > { %2090 = vmatpush3.bf16.msra.mxu0 %v2209_v0  ;;  %2177 = vmatpush3.bf16.msra.mxu1 %v2209_v0  ;;  %v2213_v5 = vld [vmem:[%s2322_s22 + $0x20] sm:$0xff]   ;;  %v2215_v7 = vld [vmem:[%s2322_s22 + $0x30] sm:$0xff]   ;;  %v2216_v8 = vld [vmem:[%s2322_s22 + $0x38] sm:$0xff]  }
  0x14   : > { %2091 = vmatprep.subr.bf16.mxu0 %v2210_v1  ;;  %2170 = vmatprep.subr.bf16.mxu1 %v2210_v1  ;;  %v2233_v9 = vld [vmem:[%s2333_s26 + $0x80] sm:$0xff]   ;;  %v2218_v10 = vld [vmem:[%s2333_s26 + $0x8] sm:$0xff]   ;;  %v2219_v11 = vld [vmem:[%s2333_s26 + $0x10] sm:$0xff]  }
  0x15   : > { %2105 = vmatprep.mubr.bf16.mxu0 %v2217_v4  ;;  %2137 = vmatprep.mubr.bf16.mxu1 %v2233_v9  ;;  %v2234_v12 = vld [vmem:[%s2333_s26 + $0x88] sm:$0xff]   ;;  %v2235_v13 = vld [vmem:[%s2333_s26 + $0x90] sm:$0xff]   ;;  %v2220_v14 = vld [vmem:[%s2333_s26 + $0x18] sm:$0xff]  }
  0x16   : > { %v2221_v15 = vld [vmem:[%s2333_s26 + $0x20] sm:$0xff]   ;;  %v2236_v16 = vld [vmem:[%s2333_s26 + $0x98] sm:$0xff]   ;;  %v2222_v18 = vld [vmem:[%s2333_s26 + $0x28] sm:$0xff]  }
  0x17   : > { %2092 = vmatpush3.bf16.msra.mxu0 %v2210_v1  ;;  %2178 = vmatpush3.bf16.msra.mxu1 %v2210_v1  ;;  %v2237_v17 = vld [vmem:[%s2333_s26 + $0xa0] sm:$0xff]   ;;  %v2238_v19 = vld [vmem:[%s2333_s26 + $0xa8] sm:$0xff]   ;;  %v2223_v20 = vld [vmem:[%s2333_s26 + $0x30] sm:$0xff]  }
  0x18   : > { %2093 = vmatprep.subr.bf16.mxu0 %v2211_v2  ;;  %2171 = vmatprep.subr.bf16.mxu1 %v2211_v2  ;;  %v2239_v21 = vld [vmem:[%s2333_s26 + $0xb0] sm:$0xff]   ;;  %v2224_v22 = vld [vmem:[%s2333_s26 + $0x38] sm:$0xff]   ;;  %v2225_v24 = vld [vmem:[%s2333_s26 + $0x40] sm:$0xff]  }
  0x19   : > { %v2240_v23 = vld [vmem:[%s2333_s26 + $0xb8] sm:$0xff]   ;;  %v2241_v25 = vld [vmem:[%s2333_s26 + $0xc0] sm:$0xff]   ;;  %v2226_v26 = vld [vmem:[%s2333_s26 + $0x48] sm:$0xff]  }
  0x1a   : > { %v2242_v27 = vld [vmem:[%s2333_s26 + $0xc8] sm:$0xff]   ;;  %v2227_v28 = vld [vmem:[%s2333_s26 + $0x50] sm:$0xff]   ;;  %v2228_v30 = vld [vmem:[%s2333_s26 + $0x58] sm:$0xff]  }
  0x1b   : > { %2094 = vmatpush3.bf16.msra.mxu0 %v2211_v2  ;;  %2179 = vmatpush3.bf16.msra.mxu1 %v2211_v2  ;;  %v2243_v29 = vld [vmem:[%s2333_s26 + $0xd0] sm:$0xff]   ;;  %v2244_v31 = vld [vmem:[%s2333_s26 + $0xd8] sm:$0xff]   ;;  %v2229_v32 = vld [vmem:[%s2333_s26 + $0x60] sm:$0xff]  }
  0x1c   : > { %2095 = vmatprep.subr.bf16.mxu0 %v2212_v3  ;;  %2172 = vmatprep.subr.bf16.mxu1 %v2212_v3  ;;  %v2245_v33 = vld [vmem:[%s2333_s26 + $0xe0] sm:$0xff]   ;;  %v2230_v34 = vld [vmem:[%s2333_s26 + $0x68] sm:$0xff]   ;;  %v2231_v36 = vld [vmem:[%s2333_s26 + $0x70] sm:$0xff]  }
  0x1d   : > { %v2246_v35 = vld [vmem:[%s2333_s26 + $0xe8] sm:$0xff]   ;;  %v2247_v37 = vld [vmem:[%s2333_s26 + $0xf0] sm:$0xff]   ;;  %v2232_v38 = vld [vmem:[%s2333_s26 + $0x78] sm:$0xff]  }
  0x1e   : > { %v2248_v39 = vld [vmem:[%s2333_s26 + $0xf8] sm:$0xff]  }
  0x1f   : > { %2096 = vmatpush3.bf16.msra.mxu0 %v2212_v3  ;;  %2180 = vmatpush3.bf16.msra.mxu1 %v2212_v3 }
  0x20   : > { %2097 = vmatprep.subr.bf16.mxu0 %v2213_v5  ;;  %2173 = vmatprep.subr.bf16.mxu1 %v2213_v5 }
  0x23   : > { %2098 = vmatpush3.bf16.msra.mxu0 %v2213_v5  ;;  %2181 = vmatpush3.bf16.msra.mxu1 %v2213_v5 }
  0x24   : > { %2099 = vmatprep.subr.bf16.mxu0 %v2214_v6  ;;  %2174 = vmatprep.subr.bf16.mxu1 %v2214_v6 }
  0x27   : > { %2100 = vmatpush3.bf16.msra.mxu0 %v2214_v6  ;;  %2182 = vmatpush3.bf16.msra.mxu1 %v2214_v6 }
  0x28   : > { %2101 = vmatprep.subr.bf16.mxu0 %v2215_v7  ;;  %2175 = vmatprep.subr.bf16.mxu1 %v2215_v7 }
  0x2b   : > { %2102 = vmatpush3.bf16.msra.mxu0 %v2215_v7  ;;  %2183 = vmatpush3.bf16.msra.mxu1 %v2215_v7 }
  0x2c   : > { %2103 = vmatprep.subr.bf16.mxu0 %v2216_v8  ;;  %2176 = vmatprep.subr.bf16.mxu1 %v2216_v8 }
  0x2f   : > { %2104 = vmatpush3.bf16.msra.mxu0 %v2216_v8  ;;  %2184 = vmatpush3.bf16.msra.mxu1 %v2216_v8 }
  0x32   : > { %2106 = vmatmul.mubr.bf16.vlgmr.msra.gmra.mrb[0].mxu0 %v2218_v10  ;;  %2138 = vmatmul.mubr.bf16.vlgmr.msra.gmra.mrb[0].mxu1 %v2234_v12 }
  0x33   : > { %2109 = vmatprep.mubr.bf16.mxu0 %v2219_v11  ;;  %2141 = vmatprep.mubr.bf16.mxu1 %v2235_v13 }
  0x3a   : > { %2110 = vmatmul.mubr.bf16.gmra.mrb[4].mxu0 %v2220_v14  ;;  %2142 = vmatmul.mubr.bf16.gmra.mrb[4].mxu1 %v2236_v16 }
  0x3b   : > { %2113 = vmatprep.mubr.bf16.mxu0 %v2221_v15  ;;  %2145 = vmatprep.mubr.bf16.mxu1 %v2237_v17 }
  0x42   : > { %2114 = vmatmul.mubr.bf16.gmra.mrb[8].mxu0 %v2222_v18  ;;  %2146 = vmatmul.mubr.bf16.gmra.mrb[8].mxu1 %v2238_v19 }
  0x43   : > { %2117 = vmatprep.mubr.bf16.mxu0 %v2223_v20  ;;  %2149 = vmatprep.mubr.bf16.mxu1 %v2239_v21 }
  0x4a   : > { %2118 = vmatmul.mubr.bf16.gmra.mrb[12].mxu0 %v2224_v22  ;;  %2150 = vmatmul.mubr.bf16.gmra.mrb[12].mxu1 %v2240_v23 }
  0x4b   : > { %2121 = vmatprep.mubr.bf16.mxu0 %v2225_v24  ;;  %2153 = vmatprep.mubr.bf16.mxu1 %v2241_v25 }
  0x52   : > { %2122 = vmatmul.mubr.bf16.gmra.mrb[16].mxu0 %v2226_v26  ;;  %2154 = vmatmul.mubr.bf16.gmra.mrb[16].mxu1 %v2242_v27 }
  0x53   : > { %2125 = vmatprep.mubr.bf16.mxu0 %v2227_v28  ;;  %2157 = vmatprep.mubr.bf16.mxu1 %v2243_v29 }
  0x5a   : > { %2126 = vmatmul.mubr.bf16.gmra.mrb[20].mxu0 %v2228_v30  ;;  %2158 = vmatmul.mubr.bf16.gmra.mrb[20].mxu1 %v2244_v31 }
  0x5b   : > { %2129 = vmatprep.mubr.bf16.mxu0 %v2229_v32  ;;  %2161 = vmatprep.mubr.bf16.mxu1 %v2245_v33 }
  0x62   : > { %2130 = vmatmul.mubr.bf16.gmra.mrb[24].mxu0 %v2230_v34  ;;  %2162 = vmatmul.mubr.bf16.gmra.mrb[24].mxu1 %v2246_v35 }
  0x63   : > { %2133 = vmatprep.mubr.bf16.mxu0 %v2231_v36  ;;  %2165 = vmatprep.mubr.bf16.mxu1 %v2247_v37 }
  0x6a   : > { %2134 = vmatmul.mubr.bf16.gmra.mrb[28].mxu0 %v2232_v38  ;;  %2166 = vmatmul.mubr.bf16.gmra.mrb[28].mxu1 %v2248_v39 }
 0x105   : > { %v2107_v40 = vpop.f32.mrb[0].mxu0  ;;  %v2372_v41 = vpop.f32.mrb[0].mxu1 }
 0x106   : > { %v687_v42 = vpop.f32.mrb[1].mxu0  ;;  %v2374_v43 = vpop.f32.mrb[1].mxu1  ;;  %v1014_v55 = vmul.f32 %v2107_v40, %v2107_v40 }
 0x107   : > { %v2108_v44 = vpop.f32.mrb[2].mxu0  ;;  %v2383_v45 = vpop.f32.mrb[2].mxu1  ;;  %v1012_v50 = vmul.f32 %v687_v42, %v687_v42 }
 0x108   : > { %v1866_v46 = vpack.c.bf16 %v2108_v44, %v2107_v40  ;;  %v690_v47 = vpop.f32.mrb[3].mxu0  ;;  %v1946_v48 = vpack.c.bf16 %v2383_v45, %v2372_v41  ;;  %v2387_v49 = vpop.f32.mrb[3].mxu1  ;;  %v1015_v58 = vmul.f32 %v2108_v44, %v2108_v44 }
 0x109   : > { %v942_v51 = vadd.f32 %v690_v47, %v687_v42  ;;  %v1013_v52 = vmul.f32 %v690_v47, %v690_v47  ;;  %v1861_v53 = vpack.c.bf16 %v690_v47, %v687_v42  ;;  %v1941_v54 = vpack.c.bf16 %v2387_v49, %v2374_v43 }
 0x10a   : > { %2018 = vst [vmem:[%s2381_s29 + $0x8] sm:$0xff] %v1866_v46   ;;  %2034 = vst [vmem:[%s2381_s29 + $0x88] sm:$0xff] %v1946_v48  }
 0x10b   : > { %v943_v56 = vadd.f32 %v2107_v40, %v942_v51  ;;  %v1076_v57 = vadd.f32 %v1013_v52, %v1012_v50  ;;  %1862 = vst [vmem:[%s2381_s29] sm:$0xff] %v1861_v53   ;;  %2033 = vst [vmem:[%s2381_s29 + $0x80] sm:$0xff] %v1941_v54  }
 0x10d   : > { %v1077_v59 = vadd.f32 %v1076_v57, %v1014_v55  ;;  %v2111_v60 = vpop.f32.mrb[4].mxu0  ;;  %v944_v61 = vadd.f32 %v2108_v44, %v943_v56  ;;  %v2395_v62 = vpop.f32.mrb[4].mxu1 }
 0x10e   : > { %v703_v63 = vpop.f32.mrb[5].mxu0  ;;  %v2397_v0 = vpop.f32.mrb[5].mxu1  ;;  %v1018_v15 = vmul.f32 %v2111_v60, %v2111_v60 }
 0x10f   : > { %v945_v1 = vadd.f32 %v944_v61, %v703_v63  ;;  %v1016_v2 = vmul.f32 %v703_v63, %v703_v63  ;;  %v1078_v3 = vadd.f32 %v1077_v59, %v1015_v58  ;;  %v2112_v4 = vpop.f32.mrb[6].mxu0  ;;  %v2399_v5 = vpop.f32.mrb[6].mxu1 }
 0x110   : > { %v1876_v6 = vpack.c.bf16 %v2112_v4, %v2111_v60  ;;  %v706_v7 = vpop.f32.mrb[7].mxu0  ;;  %v1956_v8 = vpack.c.bf16 %v2399_v5, %v2395_v62  ;;  %v2403_v9 = vpop.f32.mrb[7].mxu1  ;;  %v1019_v18 = vmul.f32 %v2112_v4, %v2112_v4 }
 0x111   : > { %v1079_v10 = vadd.f32 %v1078_v3, %v1016_v2  ;;  %v946_v11 = vadd.f32 %v945_v1, %v706_v7  ;;  %v1017_v12 = vmul.f32 %v706_v7, %v706_v7  ;;  %v1871_v13 = vpack.c.bf16 %v706_v7, %v703_v63 }
 0x112   : > { %2020 = vst [vmem:[%s2381_s29 + $0x18] sm:$0xff] %v1876_v6   ;;  %2036 = vst [vmem:[%s2381_s29 + $0x98] sm:$0xff] %v1956_v8   ;;  %v1951_v14 = vpack.c.bf16 %v2403_v9, %v2397_v0 }
 0x113   : > { %v947_v16 = vadd.f32 %v2111_v60, %v946_v11  ;;  %v1080_v17 = vadd.f32 %v1079_v10, %v1017_v12  ;;  %2019 = vst [vmem:[%s2381_s29 + $0x10] sm:$0xff] %v1871_v13  }
 0x114   : > { %2035 = vst [vmem:[%s2381_s29 + $0x90] sm:$0xff] %v1951_v14  }
 0x115   : > { %v1081_v19 = vadd.f32 %v1080_v17, %v1018_v15  ;;  %v2115_v20 = vpop.f32.mrb[8].mxu0  ;;  %v948_v21 = vadd.f32 %v2112_v4, %v947_v16  ;;  %v2411_v22 = vpop.f32.mrb[8].mxu1 }
 0x116   : > { %v719_v23 = vpop.f32.mrb[9].mxu0  ;;  %v2413_v24 = vpop.f32.mrb[9].mxu1  ;;  %v1022_v39 = vmul.f32 %v2115_v20, %v2115_v20 }
 0x117   : > { %v949_v25 = vadd.f32 %v948_v21, %v719_v23  ;;  %v1020_v26 = vmul.f32 %v719_v23, %v719_v23  ;;  %v1082_v27 = vadd.f32 %v1081_v19, %v1019_v18  ;;  %v2116_v28 = vpop.f32.mrb[10].mxu0  ;;  %v2415_v29 = vpop.f32.mrb[10].mxu1 }
 0x118   : > { %v1886_v30 = vpack.c.bf16 %v2116_v28, %v2115_v20  ;;  %v722_v31 = vpop.f32.mrb[11].mxu0  ;;  %v1966_v32 = vpack.c.bf16 %v2415_v29, %v2411_v22  ;;  %v2419_v33 = vpop.f32.mrb[11].mxu1  ;;  %v1023_v44 = vmul.f32 %v2116_v28, %v2116_v28 }
 0x119   : > { %v1083_v34 = vadd.f32 %v1082_v27, %v1020_v26  ;;  %v950_v35 = vadd.f32 %v949_v25, %v722_v31  ;;  %v1021_v36 = vmul.f32 %v722_v31, %v722_v31  ;;  %v1881_v37 = vpack.c.bf16 %v722_v31, %v719_v23 }
 0x11a   : > { %2022 = vst [vmem:[%s2381_s29 + $0x28] sm:$0xff] %v1886_v30   ;;  %2038 = vst [vmem:[%s2381_s29 + $0xa8] sm:$0xff] %v1966_v32   ;;  %v1961_v38 = vpack.c.bf16 %v2419_v33, %v2413_v24 }
 0x11b   : > { %v951_v40 = vadd.f32 %v2115_v20, %v950_v35  ;;  %v1084_v42 = vadd.f32 %v1083_v34, %v1021_v36  ;;  %2021 = vst [vmem:[%s2381_s29 + $0x20] sm:$0xff] %v1881_v37  }
 0x11c   : > { %2037 = vst [vmem:[%s2381_s29 + $0xa0] sm:$0xff] %v1961_v38  }
 0x11d   : > { %v1085_v46 = vadd.f32 %v1084_v42, %v1022_v39  ;;  %v2119_v47 = vpop.f32.mrb[12].mxu0  ;;  %v952_v48 = vadd.f32 %v2116_v28, %v951_v40  ;;  %v2427_v50 = vpop.f32.mrb[12].mxu1 }
 0x11e   : > { %v735_v51 = vpop.f32.mrb[13].mxu0  ;;  %v2429_v52 = vpop.f32.mrb[13].mxu1  ;;  %v1026_v6 = vmul.f32 %v2119_v47, %v2119_v47 }
 0x11f   : > { %v953_v53 = vadd.f32 %v952_v48, %v735_v51  ;;  %v1024_v54 = vmul.f32 %v735_v51, %v735_v51  ;;  %v1086_v55 = vadd.f32 %v1085_v46, %v1023_v44  ;;  %v2120_v56 = vpop.f32.mrb[14].mxu0  ;;  %v2431_v57 = vpop.f32.mrb[14].mxu1 }
 0x120   : > { %v1896_v58 = vpack.c.bf16 %v2120_v56, %v2119_v47  ;;  %v738_v59 = vpop.f32.mrb[15].mxu0  ;;  %v1976_v60 = vpack.c.bf16 %v2431_v57, %v2427_v50  ;;  %v2435_v61 = vpop.f32.mrb[15].mxu1  ;;  %v1027_v10 = vmul.f32 %v2120_v56, %v2120_v56 }
 0x121   : > { %v1087_v63 = vadd.f32 %v1086_v55, %v1024_v54  ;;  %v954_v1 = vadd.f32 %v953_v53, %v738_v59  ;;  %v1025_v2 = vmul.f32 %v738_v59, %v738_v59  ;;  %v1891_v3 = vpack.c.bf16 %v738_v59, %v735_v51 }
 0x122   : > { %2024 = vst [vmem:[%s2381_s29 + $0x38] sm:$0xff] %v1896_v58   ;;  %2040 = vst [vmem:[%s2381_s29 + $0xb8] sm:$0xff] %v1976_v60   ;;  %v1971_v4 = vpack.c.bf16 %v2435_v61, %v2429_v52 }
 0x123   : > { %v955_v7 = vadd.f32 %v2119_v47, %v954_v1  ;;  %v1088_v8 = vadd.f32 %v1087_v63, %v1025_v2  ;;  %2023 = vst [vmem:[%s2381_s29 + $0x30] sm:$0xff] %v1891_v3  }
 0x124   : > { %2039 = vst [vmem:[%s2381_s29 + $0xb0] sm:$0xff] %v1971_v4  }
 0x125   : > { %v1089_v11 = vadd.f32 %v1088_v8, %v1026_v6  ;;  %v2123_v12 = vpop.f32.mrb[16].mxu0  ;;  %v956_v13 = vadd.f32 %v2120_v56, %v955_v7  ;;  %v2443_v14 = vpop.f32.mrb[16].mxu1 }
 0x126   : > { %v751_v15 = vpop.f32.mrb[17].mxu0  ;;  %v2445_v16 = vpop.f32.mrb[17].mxu1  ;;  %v1030_v35 = vmul.f32 %v2123_v12, %v2123_v12 }
 0x127   : > { %v957_v17 = vadd.f32 %v956_v13, %v751_v15  ;;  %v1028_v18 = vmul.f32 %v751_v15, %v751_v15  ;;  %v1090_v19 = vadd.f32 %v1089_v11, %v1027_v10  ;;  %v2124_v20 = vpop.f32.mrb[18].mxu0  ;;  %v2447_v21 = vpop.f32.mrb[18].mxu1 }
 0x128   : > { %v1906_v23 = vpack.c.bf16 %v2124_v20, %v2123_v12  ;;  %v754_v25 = vpop.f32.mrb[19].mxu0  ;;  %v1986_v26 = vpack.c.bf16 %v2447_v21, %v2443_v14  ;;  %v2451_v27 = vpop.f32.mrb[19].mxu1  ;;  %v1031_v38 = vmul.f32 %v2124_v20, %v2124_v20 }
 0x129   : > { %v1091_v28 = vadd.f32 %v1090_v19, %v1028_v18  ;;  %v958_v30 = vadd.f32 %v957_v17, %v754_v25  ;;  %v1029_v31 = vmul.f32 %v754_v25, %v754_v25  ;;  %v1901_v32 = vpack.c.bf16 %v754_v25, %v751_v15 }
 0x12a   : > { %2026 = vst [vmem:[%s2381_s29 + $0x48] sm:$0xff] %v1906_v23   ;;  %2042 = vst [vmem:[%s2381_s29 + $0xc8] sm:$0xff] %v1986_v26   ;;  %v1981_v34 = vpack.c.bf16 %v2451_v27, %v2445_v16 }
 0x12b   : > { %v959_v36 = vadd.f32 %v2123_v12, %v958_v30  ;;  %v1092_v37 = vadd.f32 %v1091_v28, %v1029_v31  ;;  %2025 = vst [vmem:[%s2381_s29 + $0x40] sm:$0xff] %v1901_v32  }
 0x12c   : > { %2041 = vst [vmem:[%s2381_s29 + $0xc0] sm:$0xff] %v1981_v34  }
 0x12d   : > { %v1093_v39 = vadd.f32 %v1092_v37, %v1030_v35  ;;  %v2127_v40 = vpop.f32.mrb[20].mxu0  ;;  %v960_v42 = vadd.f32 %v2124_v20, %v959_v36  ;;  %v2459_v44 = vpop.f32.mrb[20].mxu1 }
 0x12e   : > { %v767_v46 = vpop.f32.mrb[21].mxu0  ;;  %v2461_v47 = vpop.f32.mrb[21].mxu1  ;;  %v1034_v6 = vmul.f32 %v2127_v40, %v2127_v40 }
 0x12f   : > { %v961_v48 = vadd.f32 %v960_v42, %v767_v46  ;;  %v1032_v51 = vmul.f32 %v767_v46, %v767_v46  ;;  %v1094_v53 = vadd.f32 %v1093_v39, %v1031_v38  ;;  %v2128_v54 = vpop.f32.mrb[22].mxu0  ;;  %v2463_v55 = vpop.f32.mrb[22].mxu1 }
 0x130   : > { %v1916_v56 = vpack.c.bf16 %v2128_v54, %v2127_v40  ;;  %v770_v58 = vpop.f32.mrb[23].mxu0  ;;  %v1996_v59 = vpack.c.bf16 %v2463_v55, %v2459_v44  ;;  %v2467_v60 = vpop.f32.mrb[23].mxu1  ;;  %v1035_v10 = vmul.f32 %v2128_v54, %v2128_v54 }
 0x131   : > { %v1095_v63 = vadd.f32 %v1094_v53, %v1032_v51  ;;  %v962_v1 = vadd.f32 %v961_v48, %v770_v58  ;;  %v1033_v2 = vmul.f32 %v770_v58, %v770_v58  ;;  %v1911_v3 = vpack.c.bf16 %v770_v58, %v767_v46 }
 0x132   : > { %2028 = vst [vmem:[%s2381_s29 + $0x58] sm:$0xff] %v1916_v56   ;;  %2044 = vst [vmem:[%s2381_s29 + $0xd8] sm:$0xff] %v1996_v59   ;;  %v1991_v4 = vpack.c.bf16 %v2467_v60, %v2461_v47 }
 0x133   : > { %v963_v7 = vadd.f32 %v2127_v40, %v962_v1  ;;  %v1096_v8 = vadd.f32 %v1095_v63, %v1033_v2  ;;  %2027 = vst [vmem:[%s2381_s29 + $0x50] sm:$0xff] %v1911_v3  }
 0x134   : > { %2043 = vst [vmem:[%s2381_s29 + $0xd0] sm:$0xff] %v1991_v4  }
 0x135   : > { %v1097_v11 = vadd.f32 %v1096_v8, %v1034_v6  ;;  %v2131_v12 = vpop.f32.mrb[24].mxu0  ;;  %v964_v13 = vadd.f32 %v2128_v54, %v963_v7  ;;  %v2475_v15 = vpop.f32.mrb[24].mxu1 }
 0x136   : > { %v783_v17 = vpop.f32.mrb[25].mxu0  ;;  %v2477_v18 = vpop.f32.mrb[25].mxu1  ;;  %v1038_v39 = vmul.f32 %v2131_v12, %v2131_v12 }
 0x137   : > { %v965_v19 = vadd.f32 %v964_v13, %v783_v17  ;;  %v1036_v20 = vmul.f32 %v783_v17, %v783_v17  ;;  %v1098_v23 = vadd.f32 %v1097_v11, %v1035_v10  ;;  %v2132_v25 = vpop.f32.mrb[26].mxu0  ;;  %v2479_v26 = vpop.f32.mrb[26].mxu1 }
 0x138   : > { %v1926_v28 = vpack.c.bf16 %v2132_v25, %v2131_v12  ;;  %v786_v30 = vpop.f32.mrb[27].mxu0  ;;  %v2006_v31 = vpack.c.bf16 %v2479_v26, %v2475_v15  ;;  %v2483_v32 = vpop.f32.mrb[27].mxu1  ;;  %v1039_v46 = vmul.f32 %v2132_v25, %v2132_v25 }
 0x139   : > { %v1099_v34 = vadd.f32 %v1098_v23, %v1036_v20  ;;  %v966_v35 = vadd.f32 %v965_v19, %v786_v30  ;;  %v1037_v36 = vmul.f32 %v786_v30, %v786_v30  ;;  %v1921_v37 = vpack.c.bf16 %v786_v30, %v783_v17 }
 0x13a   : > { %2030 = vst [vmem:[%s2381_s29 + $0x68] sm:$0xff] %v1926_v28   ;;  %2046 = vst [vmem:[%s2381_s29 + $0xe8] sm:$0xff] %v2006_v31   ;;  %v2001_v38 = vpack.c.bf16 %v2483_v32, %v2477_v18  ;;  %v1044_v31 = vmul.f32 %v2374_v43, %v2374_v43 }
 0x13b   : > { %v967_v40 = vadd.f32 %v2131_v12, %v966_v35  ;;  %v1100_v42 = vadd.f32 %v1099_v34, %v1037_v36  ;;  %2029 = vst [vmem:[%s2381_s29 + $0x60] sm:$0xff] %v1921_v37  }
 0x13c   : > { %2045 = vst [vmem:[%s2381_s29 + $0xe0] sm:$0xff] %v2001_v38   ;;  %v1045_v38 = vmul.f32 %v2387_v49, %v2387_v49 }
 0x13d   : > { %v1101_v48 = vadd.f32 %v1100_v42, %v1038_v39  ;;  %v2135_v51 = vpop.f32.mrb[28].mxu0  ;;  %v968_v53 = vadd.f32 %v2132_v25, %v967_v40  ;;  %v2491_v54 = vpop.f32.mrb[28].mxu1  ;;  %v1046_v39 = vmul.f32 %v2372_v41, %v2372_v41 }
 0x13e   : > { %v799_v56 = vpop.f32.mrb[29].mxu0  ;;  %v2493_v58 = vpop.f32.mrb[29].mxu1  ;;  %v1042_v19 = vmul.f32 %v2135_v51, %v2135_v51 }
 0x13f   : > { %v969_v59 = vadd.f32 %v968_v53, %v799_v56  ;;  %v1040_v63 = vmul.f32 %v799_v56, %v799_v56  ;;  %v1102_v1 = vadd.f32 %v1101_v48, %v1039_v46  ;;  %v2136_v2 = vpop.f32.mrb[30].mxu0  ;;  %v2495_v3 = vpop.f32.mrb[30].mxu1  ;;  %v1047_v46 = vmul.f32 %v2383_v45, %v2383_v45 }
 0x140   : > { %v1936_v4 = vpack.c.bf16 %v2136_v2, %v2135_v51  ;;  %v802_v6 = vpop.f32.mrb[31].mxu0  ;;  %v2016_v7 = vpack.c.bf16 %v2495_v3, %v2491_v54  ;;  %v2499_v8 = vpop.f32.mrb[31].mxu1  ;;  %v1043_v25 = vmul.f32 %v2136_v2, %v2136_v2 }
 0x141   : > { %v1103_v10 = vadd.f32 %v1102_v1, %v1040_v63  ;;  %v970_v11 = vadd.f32 %v969_v59, %v802_v6  ;;  %v1041_v12 = vmul.f32 %v802_v6, %v802_v6  ;;  %v1931_v13 = vpack.c.bf16 %v802_v6, %v799_v56 }
 0x142   : > { %2032 = vst [vmem:[%s2381_s29 + $0x78] sm:$0xff] %v1936_v4   ;;  %2048 = vst [vmem:[%s2381_s29 + $0xf8] sm:$0xff] %v2016_v7   ;;  %v2011_v17 = vpack.c.bf16 %v2499_v8, %v2493_v58  ;;  %v1049_v63 = vmul.f32 %v2403_v9, %v2403_v9 }
 0x143   : > { %v971_v20 = vadd.f32 %v2135_v51, %v970_v11  ;;  %v1104_v23 = vadd.f32 %v1103_v10, %v1041_v12  ;;  %2031 = vst [vmem:[%s2381_s29 + $0x70] sm:$0xff] %v1931_v13   ;;  %v1053_v12 = vmul.f32 %v2419_v33, %v2419_v33 }
 0x144   : > { %2047 = vst [vmem:[%s2381_s29 + $0xf0] sm:$0xff] %v2011_v17  }
 0x145   : > { %v1105_v28 = vadd.f32 %v1104_v23, %v1042_v19  ;;  %v972_v30 = vadd.f32 %v2136_v2, %v971_v20 }
 0x147   : > { %v973_v34 = vadd.f32 %v972_v30, %v2374_v43  ;;  %v1106_v35 = vadd.f32 %v1105_v28, %v1043_v25  ;;  %v1048_v43 = vmul.f32 %v2397_v0, %v2397_v0  ;;  %v1057_v30 = vmul.f32 %v2435_v61, %v2435_v61 }
 0x149   : > { %v1107_v36 = vadd.f32 %v1106_v35, %v1044_v31  ;;  %v974_v37 = vadd.f32 %v973_v34, %v2387_v49 }
 0x14b   : > { %v975_v40 = vadd.f32 %v2372_v41, %v974_v37  ;;  %v1108_v42 = vadd.f32 %v1107_v36, %v1045_v38  ;;  %v1050_v41 = vmul.f32 %v2395_v62, %v2395_v62 }
 0x14d   : > { %v1109_v48 = vadd.f32 %v1108_v42, %v1046_v39  ;;  %v976_v51 = vadd.f32 %v2383_v45, %v975_v40  ;;  %v1051_v45 = vmul.f32 %v2399_v5, %v2399_v5  ;;  %v1061_v40 = vmul.f32 %v2451_v27, %v2451_v27 }
 0x14f   : > { %v977_v53 = vadd.f32 %v976_v51, %v2397_v0  ;;  %v1110_v56 = vadd.f32 %v1109_v48, %v1047_v46  ;;  %v1052_v0 = vmul.f32 %v2413_v24, %v2413_v24 }
 0x151   : > { %v1111_v59 = vadd.f32 %v1110_v56, %v1048_v43  ;;  %v978_v49 = vadd.f32 %v977_v53, %v2403_v9 }
 0x153   : > { %v979_v1 = vadd.f32 %v2395_v62, %v978_v49  ;;  %v1112_v2 = vadd.f32 %v1111_v59, %v1049_v63  ;;  %v1054_v62 = vmul.f32 %v2411_v22, %v2411_v22  ;;  %v1065_v59 = vmul.f32 %v2467_v60, %v2467_v60 }
 0x155   : > { %v1113_v4 = vadd.f32 %v1112_v2, %v1050_v41  ;;  %v980_v6 = vadd.f32 %v2399_v5, %v979_v1  ;;  %v1055_v5 = vmul.f32 %v2415_v29, %v2415_v29 }
 0x157   : > { %v981_v7 = vadd.f32 %v980_v6, %v2413_v24  ;;  %v1114_v10 = vadd.f32 %v1113_v4, %v1051_v45  ;;  %v1056_v24 = vmul.f32 %v2429_v52, %v2429_v52  ;;  %v1069_v6 = vmul.f32 %v2483_v32, %v2483_v32 }
 0x159   : > { %v1115_v11 = vadd.f32 %v1114_v10, %v1052_v0  ;;  %v982_v9 = vadd.f32 %v981_v7, %v2419_v33 }
 0x15b   : > { %v983_v13 = vadd.f32 %v2411_v22, %v982_v9  ;;  %v1116_v17 = vadd.f32 %v1115_v11, %v1053_v12  ;;  %v1058_v22 = vmul.f32 %v2427_v50, %v2427_v50 }
 0x15d   : > { %v1117_v19 = vadd.f32 %v1116_v17, %v1054_v62  ;;  %v984_v20 = vadd.f32 %v2415_v29, %v983_v13  ;;  %v1059_v29 = vmul.f32 %v2431_v57, %v2431_v57  ;;  %v1073_v13 = vmul.f32 %v2499_v8, %v2499_v8 }
 0x15f   : > { %v985_v23 = vadd.f32 %v984_v20, %v2429_v52  ;;  %v1118_v25 = vadd.f32 %v1117_v19, %v1055_v5  ;;  %v1060_v52 = vmul.f32 %v2445_v16, %v2445_v16 }
 0x161   : > { %v1119_v28 = vadd.f32 %v1118_v25, %v1056_v24  ;;  %v986_v33 = vadd.f32 %v985_v23, %v2435_v61 }
 0x163   : > { %v987_v31 = vadd.f32 %v2427_v50, %v986_v33  ;;  %v1120_v34 = vadd.f32 %v1119_v28, %v1057_v30  ;;  %v1062_v50 = vmul.f32 %v2443_v14, %v2443_v14 }
 0x165   : > { %v1121_v35 = vadd.f32 %v1120_v34, %v1058_v22  ;;  %v988_v36 = vadd.f32 %v2431_v57, %v987_v31  ;;  %v1063_v57 = vmul.f32 %v2447_v21, %v2447_v21 }
 0x167   : > { %v989_v37 = vadd.f32 %v988_v36, %v2445_v16  ;;  %v1122_v38 = vadd.f32 %v1121_v35, %v1059_v29  ;;  %v1064_v16 = vmul.f32 %v2461_v47, %v2461_v47 }
 0x169   : > { %v1123_v39 = vadd.f32 %v1122_v38, %v1060_v52  ;;  %v990_v61 = vadd.f32 %v989_v37, %v2451_v27 }
 0x16b   : > { %v991_v42 = vadd.f32 %v2443_v14, %v990_v61  ;;  %v1124_v46 = vadd.f32 %v1123_v39, %v1061_v40  ;;  %v1066_v14 = vmul.f32 %v2459_v44, %v2459_v44 }
 0x16d   : > { %v1125_v48 = vadd.f32 %v1124_v46, %v1062_v50  ;;  %v992_v51 = vadd.f32 %v2447_v21, %v991_v42  ;;  %v1067_v21 = vmul.f32 %v2463_v55, %v2463_v55 }
 0x16f   : > { %v993_v43 = vadd.f32 %v992_v51, %v2461_v47  ;;  %v1126_v53 = vadd.f32 %v1125_v48, %v1063_v57  ;;  %v1068_v47 = vmul.f32 %v2477_v18, %v2477_v18 }
 0x171   : > { %v1127_v56 = vadd.f32 %v1126_v53, %v1064_v16  ;;  %v994_v27 = vadd.f32 %v993_v43, %v2467_v60 }
 0x173   : > { %v995_v49 = vadd.f32 %v2459_v44, %v994_v27  ;;  %v1128_v63 = vadd.f32 %v1127_v56, %v1065_v59  ;;  %v1070_v44 = vmul.f32 %v2475_v15, %v2475_v15 }
 0x175   : > { %v1129_v41 = vadd.f32 %v1128_v63, %v1066_v14  ;;  %v996_v1 = vadd.f32 %v2463_v55, %v995_v49  ;;  %v1071_v55 = vmul.f32 %v2479_v26, %v2479_v26 }
 0x177   : > { %v997_v2 = vadd.f32 %v996_v1, %v2477_v18  ;;  %v1130_v45 = vadd.f32 %v1129_v41, %v1067_v21  ;;  %v1072_v18 = vmul.f32 %v2493_v58, %v2493_v58 }
 0x179   : > { %v1131_v4 = vadd.f32 %v1130_v45, %v1068_v47  ;;  %v998_v60 = vadd.f32 %v997_v2, %v2483_v32 }
 0x17b   : > { %v999_v0 = vadd.f32 %v2475_v15, %v998_v60  ;;  %v1132_v7 = vadd.f32 %v1131_v4, %v1069_v6  ;;  %v1074_v15 = vmul.f32 %v2491_v54, %v2491_v54 }
 0x17d   : > { %v1133_v10 = vadd.f32 %v1132_v7, %v1070_v44  ;;  %v1000_v11 = vadd.f32 %v2479_v26, %v999_v0  ;;  %v1075_v26 = vmul.f32 %v2495_v3, %v2495_v3 }
 0x17f   : > { %v1001_v9 = vadd.f32 %v1000_v11, %v2493_v58  ;;  %v1134_v12 = vadd.f32 %v1133_v10, %v1071_v55 }
 0x181   : > { %v1135_v62 = vadd.f32 %v1134_v12, %v1072_v18  ;;  %v1002_v32 = vadd.f32 %v1001_v9, %v2499_v8 }
 0x183   : > { %v1003_v17 = vadd.f32 %v2491_v54, %v1002_v32  ;;  %v1136_v5 = vadd.f32 %v1135_v62, %v1073_v13 }
 0x185   : > { %v1004_v58 = vadd.f32 %v2495_v3, %v1003_v17  ;;  %v1137_v19 = vadd.f32 %v1136_v5, %v1074_v15 }
 0x187   : > { %v1005_v20 = vrot.slane %v1004_v58, 4  ;;  %v1138_v24 = vadd.f32 %v1137_v19, %v1075_v26 }
 0x189   : > { %v1006_v23 = vadd.f32 %v1005_v20, %v1004_v58  ;;  %v1139_v25 = vrot.slane %v1138_v24, 4 }
 0x18b   : > { %v1007_v28 = vrot.slane %v1006_v23, 2  ;;  %v1140_v8 = vadd.f32 %v1139_v25, %v1138_v24 }
 0x18d   : > { %v1008_v33 = vadd.f32 %v1007_v28, %v1006_v23  ;;  %v1141_v30 = vrot.slane %v1140_v8, 2 }
 0x18f   : > { %v1009_v22 = vrot.slane %v1008_v33, 1  ;;  %v1142_v31 = vadd.f32 %v1141_v30, %v1140_v8 }
 0x191   : > { %v1010_v54 = vadd.f32 %v1009_v22, %v1008_v33  ;;  %v1143_v34 = vrot.slane %v1142_v31, 1 }
 0x193   : > { %1011 = vst [vmem:[%s322_s6] sm:$0x1] %v1010_v54  ;;  %v1144_v3 = vadd.f32 %v1143_v34, %v1142_v31 }
 0x195   : > { %1145 = vst [vmem:[%s331_s9] sm:$0x1] %v1144_v3 }
 0x196 PF: > { %s15_s17 = sadd.s32 1, %s2271_s17   ;;  %s2625_s15 = smov %s2267_s16 }
 0x197   : > { %p12_p5 = scmp.ge.s32.totalorder %s15_s17, 6   ;;  %s2626_s16 = smov %s2628_s18 }
 0x199   :  { %14 = sbr.rel (!%p12_p5) target bundleno = 2 (0x2), region = 85 }

// kernel: generator_forward.9
= control target key start
LH: loop header
LB: loop body
LE: loop exit
PB: predicated region body
PF: predicated region fallthrough
CT: control target
= control target key end

     0   :  { %s2118_s9 = smov 0   ;;  %s2120_s10 = smov 0   ;;  %s2257_s0 = inlined_call_operand.vmem [shape: bf16[4,2048,128], index: 0, kind: input, shape index: {}]   ;;  %s2258_s1 = inlined_call_operand.vmem [shape: bf16[4,128,128], index: 1, kind: input, shape index: {}]   ;;  %s2259_s2 = inlined_call_operand.vmem [shape: bf16[4,2048,128], index: 2, kind: output, shape index: {}]  }
   0x1   :  { %s2122_s11 = smov 0   ;;  %s2124_s12 = smov 0  }
   0x2   :  { %s2126_s13 = smov 0  }
   0x3 LB: > { %s27_s14 = sadd.s32 1, %s2093_s11  ;;  %s31_s15 = sadd.s32 1, %s2097_s12  ;;  %s2101_s13 = sphi %s2126_s13, %s12_s13   ;;  %s2097_s12 = sphi %s2124_s12, %s2263_s12   ;;  %s2093_s11 = sphi %s2122_s11, %s2262_s11   ;;  %s2089_s10 = sphi %s2120_s10, %s2261_s10   ;;  %s2085_s9 = sphi %s2118_s9, %s2260_s9  }
   0x4   : > { %p29_p0 = scmp.ge.s32.totalorder %s27_s14, 4  ;;  %p1348_p1 = scmp.ge.s32.totalorder %s2101_s13, 1 }
   0x5   : > { %p157_p2 = scmp.lt.s32.totalorder %s2101_s13, 17 }
   0x6   : > { %s2265_s14 = smov (%p29_p0, %s27_s14), 0  ;;  %s2267_s15 = smov (!%p29_p0, %s31_s15), %s2097_s12 }
   0x7   : > { %p158_p3 = pnand %p1348_p1, %p157_p2  ;;  %p33_p4 = scmp.ge.s32.totalorder %s2267_s15, 4 }
   0x8   : > { %s1349_s16 = sshll.u32 (!%p158_p3), %s2085_s9, 6  ;;  %p199_p5 = scmp.lt.s32.totalorder (!%p158_p3), %s2089_s10, 3 }
   0x9   : > { %s2269_s15 = smov (%p33_p4, %s2267_s15), 0  ;;  %161 = sbr.rel (%p158_p3) target bundleno = 344 (0x158), region = 28 }
   0xa   : > { %p201_p6 = scmp.lt.s32.totalorder (!%p158_p3), %s1349_s16, 255 }
  0x10   : > { %s2271_s10 = smov (!%p199_p5, %s2089_s10), 3  ;;  %s2273_s16 = smov (!%p201_p6, %s1349_s16), 255 }
  0x11   : > { %s1350_s17 = sshll.u32 %s2271_s10, 8  ;;  %s1463_s18 = sshll.u32 %s2271_s10, 6 }
  0x12   : > { %s2148_s19 = sadd.s32 %s1350_s17, %s2273_s16  ;;  %s2153_s22 = scalar_lea.vmem %s2258_s1, %s1463_s18 }
  0x13   : > { %v1895_v0 = vld [vmem:[%s2153_s22] sm:$0xff]   ;;  %v1896_v1 = vld [vmem:[%s2153_s22 + $0x8] sm:$0xff]   ;;  %s1351_s23 = sshll.u32 %s2148_s19, 2  ;;  %v1897_v2 = vld [vmem:[%s2153_s22 + $0x10] sm:$0xff]  }
  0x14   : > { %1759 = vmatprep.subr.bf16.mxu0 %v1895_v0  ;;  %1839 = vmatprep.subr.bf16.mxu1 %v1895_v0  ;;  %s2164_s26 = scalar_lea.vmem %s2257_s0, %s1351_s23  ;;  %v1898_v3 = vld [vmem:[%s2153_s22 + $0x18] sm:$0xff]   ;;  %v1899_v6 = vld [vmem:[%s2153_s22 + $0x20] sm:$0xff]   ;;  %v1900_v7 = vld [vmem:[%s2153_s22 + $0x28] sm:$0xff]   ;;  %s2208_s29 = scalar_lea.vmem %s2259_s2, %s1351_s23 }
  0x15   : > { %1760 = vmatpush3.bf16.msra.mxu0 %v1895_v0  ;;  %1847 = vmatpush3.bf16.msra.mxu1 %v1895_v0  ;;  %v1903_v4 = vld [vmem:[%s2164_s26] sm:$0xff]   ;;  %v1901_v8 = vld [vmem:[%s2153_s22 + $0x30] sm:$0xff]   ;;  %v1902_v9 = vld [vmem:[%s2153_s22 + $0x38] sm:$0xff]  }
  0x16   : > { %1761 = vmatprep.subr.bf16.mxu0 %v1896_v1  ;;  %1840 = vmatprep.subr.bf16.mxu1 %v1896_v1  ;;  %v1904_v5 = vld [vmem:[%s2164_s26 + $0x80] sm:$0xff]   ;;  %v1905_v10 = vld [vmem:[%s2164_s26 + $0x8] sm:$0xff]   ;;  %v1907_v12 = vld [vmem:[%s2164_s26 + $0x10] sm:$0xff]  }
  0x17   : > { %1775 = vmatprep.mubr.bf16.mxu0 %v1903_v4  ;;  %1807 = vmatprep.mubr.bf16.mxu1 %v1904_v5  ;;  %v1906_v11 = vld [vmem:[%s2164_s26 + $0x88] sm:$0xff]   ;;  %v1908_v13 = vld [vmem:[%s2164_s26 + $0x90] sm:$0xff]   ;;  %v1909_v14 = vld [vmem:[%s2164_s26 + $0x18] sm:$0xff]  }
  0x18   : > { %v1910_v15 = vld [vmem:[%s2164_s26 + $0x98] sm:$0xff]   ;;  %v1911_v16 = vld [vmem:[%s2164_s26 + $0x20] sm:$0xff]   ;;  %v1913_v18 = vld [vmem:[%s2164_s26 + $0x28] sm:$0xff]  }
  0x19   : > { %1762 = vmatpush3.bf16.msra.mxu0 %v1896_v1  ;;  %1848 = vmatpush3.bf16.msra.mxu1 %v1896_v1  ;;  %v1912_v17 = vld [vmem:[%s2164_s26 + $0xa0] sm:$0xff]   ;;  %v1914_v19 = vld [vmem:[%s2164_s26 + $0xa8] sm:$0xff]   ;;  %v1915_v20 = vld [vmem:[%s2164_s26 + $0x30] sm:$0xff]  }
  0x1a   : > { %1763 = vmatprep.subr.bf16.mxu0 %v1897_v2  ;;  %1841 = vmatprep.subr.bf16.mxu1 %v1897_v2  ;;  %v1916_v21 = vld [vmem:[%s2164_s26 + $0xb0] sm:$0xff]   ;;  %v1917_v22 = vld [vmem:[%s2164_s26 + $0x38] sm:$0xff]   ;;  %v1919_v24 = vld [vmem:[%s2164_s26 + $0x40] sm:$0xff]  }
  0x1b   : > { %v1918_v23 = vld [vmem:[%s2164_s26 + $0xb8] sm:$0xff]   ;;  %v1920_v25 = vld [vmem:[%s2164_s26 + $0xc0] sm:$0xff]   ;;  %v1921_v26 = vld [vmem:[%s2164_s26 + $0x48] sm:$0xff]  }
  0x1c   : > { %v1922_v27 = vld [vmem:[%s2164_s26 + $0xc8] sm:$0xff]   ;;  %v1923_v28 = vld [vmem:[%s2164_s26 + $0x50] sm:$0xff]   ;;  %v1925_v30 = vld [vmem:[%s2164_s26 + $0x58] sm:$0xff]  }
  0x1d   : > { %1764 = vmatpush3.bf16.msra.mxu0 %v1897_v2  ;;  %1849 = vmatpush3.bf16.msra.mxu1 %v1897_v2  ;;  %v1924_v29 = vld [vmem:[%s2164_s26 + $0xd0] sm:$0xff]   ;;  %v1926_v31 = vld [vmem:[%s2164_s26 + $0xd8] sm:$0xff]   ;;  %v1927_v32 = vld [vmem:[%s2164_s26 + $0x60] sm:$0xff]  }
  0x1e   : > { %1765 = vmatprep.subr.bf16.mxu0 %v1898_v3  ;;  %1842 = vmatprep.subr.bf16.mxu1 %v1898_v3  ;;  %v1928_v33 = vld [vmem:[%s2164_s26 + $0xe0] sm:$0xff]   ;;  %v1929_v34 = vld [vmem:[%s2164_s26 + $0x68] sm:$0xff]   ;;  %v1931_v36 = vld [vmem:[%s2164_s26 + $0x70] sm:$0xff]  }
  0x1f   : > { %v1930_v35 = vld [vmem:[%s2164_s26 + $0xe8] sm:$0xff]   ;;  %v1932_v37 = vld [vmem:[%s2164_s26 + $0xf0] sm:$0xff]   ;;  %v1933_v38 = vld [vmem:[%s2164_s26 + $0x78] sm:$0xff]  }
  0x20   : > { %v1934_v39 = vld [vmem:[%s2164_s26 + $0xf8] sm:$0xff]  }
  0x21   : > { %1766 = vmatpush3.bf16.msra.mxu0 %v1898_v3  ;;  %1850 = vmatpush3.bf16.msra.mxu1 %v1898_v3 }
  0x22   : > { %1767 = vmatprep.subr.bf16.mxu0 %v1899_v6  ;;  %1843 = vmatprep.subr.bf16.mxu1 %v1899_v6 }
  0x25   : > { %1768 = vmatpush3.bf16.msra.mxu0 %v1899_v6  ;;  %1851 = vmatpush3.bf16.msra.mxu1 %v1899_v6 }
  0x26   : > { %1769 = vmatprep.subr.bf16.mxu0 %v1900_v7  ;;  %1844 = vmatprep.subr.bf16.mxu1 %v1900_v7 }
  0x29   : > { %1770 = vmatpush3.bf16.msra.mxu0 %v1900_v7  ;;  %1852 = vmatpush3.bf16.msra.mxu1 %v1900_v7 }
  0x2a   : > { %1771 = vmatprep.subr.bf16.mxu0 %v1901_v8  ;;  %1845 = vmatprep.subr.bf16.mxu1 %v1901_v8 }
  0x2d   : > { %1772 = vmatpush3.bf16.msra.mxu0 %v1901_v8  ;;  %1853 = vmatpush3.bf16.msra.mxu1 %v1901_v8 }
  0x2e   : > { %1773 = vmatprep.subr.bf16.mxu0 %v1902_v9  ;;  %1846 = vmatprep.subr.bf16.mxu1 %v1902_v9 }
  0x31   : > { %1774 = vmatpush3.bf16.msra.mxu0 %v1902_v9  ;;  %1854 = vmatpush3.bf16.msra.mxu1 %v1902_v9 }
  0x34   : > { %1776 = vmatmul.mubr.bf16.vlgmr.msra.gmra.mrb[0].mxu0 %v1905_v10  ;;  %1808 = vmatmul.mubr.bf16.vlgmr.msra.gmra.mrb[0].mxu1 %v1906_v11 }
  0x35   : > { %1779 = vmatprep.mubr.bf16.mxu0 %v1907_v12  ;;  %1811 = vmatprep.mubr.bf16.mxu1 %v1908_v13 }
  0x3c   : > { %1780 = vmatmul.mubr.bf16.gmra.mrb[4].mxu0 %v1909_v14  ;;  %1812 = vmatmul.mubr.bf16.gmra.mrb[4].mxu1 %v1910_v15 }
  0x3d   : > { %1783 = vmatprep.mubr.bf16.mxu0 %v1911_v16  ;;  %1815 = vmatprep.mubr.bf16.mxu1 %v1912_v17 }
  0x44   : > { %1784 = vmatmul.mubr.bf16.gmra.mrb[8].mxu0 %v1913_v18  ;;  %1816 = vmatmul.mubr.bf16.gmra.mrb[8].mxu1 %v1914_v19 }
  0x45   : > { %1787 = vmatprep.mubr.bf16.mxu0 %v1915_v20  ;;  %1819 = vmatprep.mubr.bf16.mxu1 %v1916_v21 }
  0x4c   : > { %1788 = vmatmul.mubr.bf16.gmra.mrb[12].mxu0 %v1917_v22  ;;  %1820 = vmatmul.mubr.bf16.gmra.mrb[12].mxu1 %v1918_v23 }
  0x4d   : > { %1791 = vmatprep.mubr.bf16.mxu0 %v1919_v24  ;;  %1823 = vmatprep.mubr.bf16.mxu1 %v1920_v25 }
  0x54   : > { %1792 = vmatmul.mubr.bf16.gmra.mrb[16].mxu0 %v1921_v26  ;;  %1824 = vmatmul.mubr.bf16.gmra.mrb[16].mxu1 %v1922_v27 }
  0x55   : > { %1795 = vmatprep.mubr.bf16.mxu0 %v1923_v28  ;;  %1827 = vmatprep.mubr.bf16.mxu1 %v1924_v29 }
  0x5c   : > { %1796 = vmatmul.mubr.bf16.gmra.mrb[20].mxu0 %v1925_v30  ;;  %1828 = vmatmul.mubr.bf16.gmra.mrb[20].mxu1 %v1926_v31 }
  0x5d   : > { %1799 = vmatprep.mubr.bf16.mxu0 %v1927_v32  ;;  %1831 = vmatprep.mubr.bf16.mxu1 %v1928_v33 }
  0x64   : > { %1800 = vmatmul.mubr.bf16.gmra.mrb[24].mxu0 %v1929_v34  ;;  %1832 = vmatmul.mubr.bf16.gmra.mrb[24].mxu1 %v1930_v35 }
  0x65   : > { %1803 = vmatprep.mubr.bf16.mxu0 %v1931_v36  ;;  %1835 = vmatprep.mubr.bf16.mxu1 %v1932_v37 }
  0x6c   : > { %1804 = vmatmul.mubr.bf16.gmra.mrb[28].mxu0 %v1933_v38  ;;  %1836 = vmatmul.mubr.bf16.gmra.mrb[28].mxu1 %v1934_v39 }
 0x107   : > { %v1777_v40 = vpop.f32.mrb[0].mxu0  ;;  %v1809_v41 = vpop.f32.mrb[0].mxu1 }
 0x108   : > { %1935 = vtanh.f32 %v1777_v40  ;;  %v584_v42 = vpop.f32.mrb[1].mxu0  ;;  %v712_v43 = vpop.f32.mrb[1].mxu1 }
 0x109   : > { %1937 = vtanh.f32 %v1809_v41  ;;  %v1778_v44 = vpop.f32.mrb[2].mxu0  ;;  %v1810_v45 = vpop.f32.mrb[2].mxu1 }
 0x10a   : > { %1939 = vtanh.f32 %v584_v42  ;;  %v587_v46 = vpop.f32.mrb[3].mxu0  ;;  %v715_v47 = vpop.f32.mrb[3].mxu1 }
 0x10b   : > { %1941 = vtanh.f32 %v712_v43 }
 0x10c   : > { %1943 = vtanh.f32 %v1778_v44 }
 0x10d   : > { %1945 = vtanh.f32 %v1810_v45 }
 0x10e   : > { %1947 = vtanh.f32 %v587_v46 }
 0x10f   : > { %1949 = vtanh.f32 %v715_v47  ;;  %v1781_v48 = vpop.f32.mrb[4].mxu0  ;;  %v1813_v49 = vpop.f32.mrb[4].mxu1 }
 0x110   : > { %1951 = vtanh.f32 %v1781_v48  ;;  %v600_v50 = vpop.f32.mrb[5].mxu0  ;;  %v728_v51 = vpop.f32.mrb[5].mxu1 }
 0x111   : > { %1953 = vtanh.f32 %v1813_v49  ;;  %v1782_v52 = vpop.f32.mrb[6].mxu0  ;;  %v1814_v53 = vpop.f32.mrb[6].mxu1 }
 0x112   : > { %v1936_v54 = vpop.eup %1935  ;;  %1955 = vtanh.f32 %v600_v50  ;;  %v603_v55 = vpop.f32.mrb[7].mxu0 }
 0x113   : > { %v731_v56 = vpop.f32.mrb[7].mxu1  ;;  %v1938_v57 = vpop.eup %1937  ;;  %1957 = vtanh.f32 %v728_v51 }
 0x114   : > { %v1940_v58 = vpop.eup %1939  ;;  %1959 = vtanh.f32 %v1782_v52 }
 0x115   : > { %v1942_v59 = vpop.eup %1941  ;;  %1961 = vtanh.f32 %v1814_v53 }
 0x116   : > { %v1944_v60 = vpop.eup %1943  ;;  %1963 = vtanh.f32 %v603_v55 }
 0x117   : > { %v1946_v61 = vpop.eup %1945  ;;  %v1536_v62 = vpack.c.bf16 %v1944_v60, %v1936_v54  ;;  %1965 = vtanh.f32 %v731_v56  ;;  %v1785_v63 = vpop.f32.mrb[8].mxu0 }
 0x118   : > { %v1817_v0 = vpop.f32.mrb[8].mxu1  ;;  %v1948_v1 = vpop.eup %1947  ;;  %v1616_v2 = vpack.c.bf16 %v1946_v61, %v1938_v57  ;;  %1967 = vtanh.f32 %v1785_v63 }
 0x119   : > { %v616_v3 = vpop.f32.mrb[9].mxu0  ;;  %v744_v4 = vpop.f32.mrb[9].mxu1  ;;  %1688 = vst [vmem:[%s2208_s29 + $0x8] sm:$0xff] %v1536_v62   ;;  %v1531_v6 = vpack.c.bf16 %v1948_v1, %v1940_v58  ;;  %1969 = vtanh.f32 %v1817_v0 }
 0x11a   : > { %v1950_v5 = vpop.eup %1949  ;;  %v1786_v7 = vpop.f32.mrb[10].mxu0  ;;  %1704 = vst [vmem:[%s2208_s29 + $0x88] sm:$0xff] %v1616_v2   ;;  %1971 = vtanh.f32 %v616_v3 }
 0x11b   : > { %v1818_v8 = vpop.f32.mrb[10].mxu1  ;;  %v1952_v9 = vpop.eup %1951  ;;  %v1611_v10 = vpack.c.bf16 %v1950_v5, %v1942_v59  ;;  %1532 = vst [vmem:[%s2208_s29] sm:$0xff] %v1531_v6   ;;  %1973 = vtanh.f32 %v744_v4 }
 0x11c   : > { %v619_v11 = vpop.f32.mrb[11].mxu0  ;;  %v747_v12 = vpop.f32.mrb[11].mxu1  ;;  %1975 = vtanh.f32 %v1786_v7 }
 0x11d   : > { %v1954_v13 = vpop.eup %1953  ;;  %1703 = vst [vmem:[%s2208_s29 + $0x80] sm:$0xff] %v1611_v10   ;;  %1977 = vtanh.f32 %v1818_v8 }
 0x11e   : > { %v1956_v14 = vpop.eup %1955  ;;  %1979 = vtanh.f32 %v619_v11 }
 0x11f   : > { %v1958_v15 = vpop.eup %1957  ;;  %1981 = vtanh.f32 %v747_v12  ;;  %v1789_v19 = vpop.f32.mrb[12].mxu0 }
 0x120   : > { %v1960_v16 = vpop.eup %1959  ;;  %v1821_v20 = vpop.f32.mrb[12].mxu1  ;;  %1983 = vtanh.f32 %v1789_v19 }
 0x121   : > { %v1962_v17 = vpop.eup %1961  ;;  %v1546_v18 = vpack.c.bf16 %v1960_v16, %v1952_v9  ;;  %v632_v23 = vpop.f32.mrb[13].mxu0  ;;  %1985 = vtanh.f32 %v1821_v20 }
 0x122   : > { %v1964_v21 = vpop.eup %1963  ;;  %v1626_v22 = vpack.c.bf16 %v1962_v17, %v1954_v13  ;;  %v760_v24 = vpop.f32.mrb[13].mxu1  ;;  %1987 = vtanh.f32 %v632_v23 }
 0x123   : > { %v1966_v25 = vpop.eup %1965  ;;  %1690 = vst [vmem:[%s2208_s29 + $0x18] sm:$0xff] %v1546_v18   ;;  %v1541_v26 = vpack.c.bf16 %v1964_v21, %v1956_v14  ;;  %v1790_v27 = vpop.f32.mrb[14].mxu0  ;;  %1989 = vtanh.f32 %v760_v24 }
 0x124   : > { %v1822_v28 = vpop.f32.mrb[14].mxu1  ;;  %v1968_v29 = vpop.eup %1967  ;;  %1706 = vst [vmem:[%s2208_s29 + $0x98] sm:$0xff] %v1626_v22   ;;  %v1621_v30 = vpack.c.bf16 %v1966_v25, %v1958_v15  ;;  %1991 = vtanh.f32 %v1790_v27 }
 0x125   : > { %v635_v31 = vpop.f32.mrb[15].mxu0  ;;  %v763_v32 = vpop.f32.mrb[15].mxu1  ;;  %1689 = vst [vmem:[%s2208_s29 + $0x10] sm:$0xff] %v1541_v26   ;;  %1993 = vtanh.f32 %v1822_v28 }
 0x126   : > { %v1970_v33 = vpop.eup %1969  ;;  %1705 = vst [vmem:[%s2208_s29 + $0x90] sm:$0xff] %v1621_v30   ;;  %1995 = vtanh.f32 %v635_v31 }
 0x127   : > { %v1972_v34 = vpop.eup %1971  ;;  %1997 = vtanh.f32 %v763_v32  ;;  %v1793_v39 = vpop.f32.mrb[16].mxu0 }
 0x128   : > { %v1974_v35 = vpop.eup %1973  ;;  %v1825_v40 = vpop.f32.mrb[16].mxu1  ;;  %1999 = vtanh.f32 %v1793_v39 }
 0x129   : > { %v1976_v36 = vpop.eup %1975  ;;  %v648_v43 = vpop.f32.mrb[17].mxu0  ;;  %2001 = vtanh.f32 %v1825_v40 }
 0x12a   : > { %v1978_v37 = vpop.eup %1977  ;;  %v1556_v38 = vpack.c.bf16 %v1976_v36, %v1968_v29  ;;  %v776_v44 = vpop.f32.mrb[17].mxu1  ;;  %2003 = vtanh.f32 %v648_v43 }
 0x12b   : > { %v1980_v41 = vpop.eup %1979  ;;  %v1636_v42 = vpack.c.bf16 %v1978_v37, %v1970_v33  ;;  %v1794_v47 = vpop.f32.mrb[18].mxu0  ;;  %2005 = vtanh.f32 %v776_v44 }
 0x12c   : > { %v1982_v45 = vpop.eup %1981  ;;  %1692 = vst [vmem:[%s2208_s29 + $0x28] sm:$0xff] %v1556_v38   ;;  %v1551_v46 = vpack.c.bf16 %v1980_v41, %v1972_v34  ;;  %v1826_v48 = vpop.f32.mrb[18].mxu1  ;;  %2007 = vtanh.f32 %v1794_v47 }
 0x12d   : > { %v1984_v49 = vpop.eup %1983  ;;  %1708 = vst [vmem:[%s2208_s29 + $0xa8] sm:$0xff] %v1636_v42   ;;  %v1631_v50 = vpack.c.bf16 %v1982_v45, %v1974_v35  ;;  %v651_v51 = vpop.f32.mrb[19].mxu0  ;;  %2009 = vtanh.f32 %v1826_v48 }
 0x12e   : > { %v779_v52 = vpop.f32.mrb[19].mxu1  ;;  %v1986_v53 = vpop.eup %1985  ;;  %1691 = vst [vmem:[%s2208_s29 + $0x20] sm:$0xff] %v1551_v46   ;;  %2011 = vtanh.f32 %v651_v51 }
 0x12f   : > { %v1988_v54 = vpop.eup %1987  ;;  %1707 = vst [vmem:[%s2208_s29 + $0xa0] sm:$0xff] %v1631_v50   ;;  %2013 = vtanh.f32 %v779_v52  ;;  %v1797_v59 = vpop.f32.mrb[20].mxu0 }
 0x130   : > { %v1990_v55 = vpop.eup %1989  ;;  %v1829_v60 = vpop.f32.mrb[20].mxu1  ;;  %2015 = vtanh.f32 %v1797_v59 }
 0x131   : > { %v1992_v56 = vpop.eup %1991  ;;  %v664_v63 = vpop.f32.mrb[21].mxu0  ;;  %2017 = vtanh.f32 %v1829_v60 }
 0x132   : > { %v1994_v57 = vpop.eup %1993  ;;  %v1566_v58 = vpack.c.bf16 %v1992_v56, %v1984_v49  ;;  %v792_v0 = vpop.f32.mrb[21].mxu1  ;;  %2019 = vtanh.f32 %v664_v63 }
 0x133   : > { %v1996_v61 = vpop.eup %1995  ;;  %v1646_v62 = vpack.c.bf16 %v1994_v57, %v1986_v53  ;;  %v1798_v3 = vpop.f32.mrb[22].mxu0  ;;  %2021 = vtanh.f32 %v792_v0 }
 0x134   : > { %v1998_v1 = vpop.eup %1997  ;;  %1694 = vst [vmem:[%s2208_s29 + $0x38] sm:$0xff] %v1566_v58   ;;  %v1561_v2 = vpack.c.bf16 %v1996_v61, %v1988_v54  ;;  %v1830_v4 = vpop.f32.mrb[22].mxu1  ;;  %2023 = vtanh.f32 %v1798_v3 }
 0x135   : > { %v2000_v5 = vpop.eup %1999  ;;  %1710 = vst [vmem:[%s2208_s29 + $0xb8] sm:$0xff] %v1646_v62   ;;  %v1641_v6 = vpack.c.bf16 %v1998_v1, %v1990_v55  ;;  %v667_v7 = vpop.f32.mrb[23].mxu0  ;;  %2025 = vtanh.f32 %v1830_v4 }
 0x136   : > { %v795_v8 = vpop.f32.mrb[23].mxu1  ;;  %v2002_v9 = vpop.eup %2001  ;;  %1693 = vst [vmem:[%s2208_s29 + $0x30] sm:$0xff] %v1561_v2   ;;  %2027 = vtanh.f32 %v667_v7 }
 0x137   : > { %v2004_v10 = vpop.eup %2003  ;;  %1709 = vst [vmem:[%s2208_s29 + $0xb0] sm:$0xff] %v1641_v6   ;;  %2029 = vtanh.f32 %v795_v8  ;;  %v1801_v15 = vpop.f32.mrb[24].mxu0 }
 0x138   : > { %v2006_v11 = vpop.eup %2005  ;;  %v1833_v16 = vpop.f32.mrb[24].mxu1  ;;  %2031 = vtanh.f32 %v1801_v15 }
 0x139   : > { %v2008_v12 = vpop.eup %2007  ;;  %v680_v19 = vpop.f32.mrb[25].mxu0  ;;  %2033 = vtanh.f32 %v1833_v16 }
 0x13a   : > { %v2010_v13 = vpop.eup %2009  ;;  %v1576_v14 = vpack.c.bf16 %v2008_v12, %v2000_v5  ;;  %v808_v20 = vpop.f32.mrb[25].mxu1  ;;  %2035 = vtanh.f32 %v680_v19 }
 0x13b   : > { %v2012_v17 = vpop.eup %2011  ;;  %v1656_v18 = vpack.c.bf16 %v2010_v13, %v2002_v9  ;;  %v1802_v23 = vpop.f32.mrb[26].mxu0  ;;  %2037 = vtanh.f32 %v808_v20 }
 0x13c   : > { %v2014_v21 = vpop.eup %2013  ;;  %1696 = vst [vmem:[%s2208_s29 + $0x48] sm:$0xff] %v1576_v14   ;;  %v1571_v22 = vpack.c.bf16 %v2012_v17, %v2004_v10  ;;  %v1834_v24 = vpop.f32.mrb[26].mxu1  ;;  %2039 = vtanh.f32 %v1802_v23 }
 0x13d   : > { %v2016_v25 = vpop.eup %2015  ;;  %1712 = vst [vmem:[%s2208_s29 + $0xc8] sm:$0xff] %v1656_v18   ;;  %v1651_v26 = vpack.c.bf16 %v2014_v21, %v2006_v11  ;;  %v683_v27 = vpop.f32.mrb[27].mxu0  ;;  %2041 = vtanh.f32 %v1834_v24 }
 0x13e   : > { %v811_v28 = vpop.f32.mrb[27].mxu1  ;;  %v2018_v29 = vpop.eup %2017  ;;  %1695 = vst [vmem:[%s2208_s29 + $0x40] sm:$0xff] %v1571_v22   ;;  %2043 = vtanh.f32 %v683_v27 }
 0x13f   : > { %v2020_v30 = vpop.eup %2019  ;;  %1711 = vst [vmem:[%s2208_s29 + $0xc0] sm:$0xff] %v1651_v26   ;;  %2045 = vtanh.f32 %v811_v28  ;;  %v1805_v35 = vpop.f32.mrb[28].mxu0 }
 0x140   : > { %v2022_v31 = vpop.eup %2021  ;;  %v1837_v36 = vpop.f32.mrb[28].mxu1  ;;  %2047 = vtanh.f32 %v1805_v35 }
 0x141   : > { %v2024_v32 = vpop.eup %2023  ;;  %v696_v39 = vpop.f32.mrb[29].mxu0  ;;  %2049 = vtanh.f32 %v1837_v36 }
 0x142   : > { %v2026_v33 = vpop.eup %2025  ;;  %v1586_v34 = vpack.c.bf16 %v2024_v32, %v2016_v25  ;;  %v824_v40 = vpop.f32.mrb[29].mxu1  ;;  %2051 = vtanh.f32 %v696_v39 }
 0x143   : > { %v2028_v37 = vpop.eup %2027  ;;  %v1666_v38 = vpack.c.bf16 %v2026_v33, %v2018_v29  ;;  %v1806_v43 = vpop.f32.mrb[30].mxu0  ;;  %2053 = vtanh.f32 %v824_v40 }
 0x144   : > { %v2030_v41 = vpop.eup %2029  ;;  %1698 = vst [vmem:[%s2208_s29 + $0x58] sm:$0xff] %v1586_v34   ;;  %v1581_v42 = vpack.c.bf16 %v2028_v37, %v2020_v30  ;;  %v1838_v44 = vpop.f32.mrb[30].mxu1  ;;  %2055 = vtanh.f32 %v1806_v43 }
 0x145   : > { %v2032_v45 = vpop.eup %2031  ;;  %1714 = vst [vmem:[%s2208_s29 + $0xd8] sm:$0xff] %v1666_v38   ;;  %v1661_v46 = vpack.c.bf16 %v2030_v41, %v2022_v31  ;;  %v699_v47 = vpop.f32.mrb[31].mxu0  ;;  %2057 = vtanh.f32 %v1838_v44 }
 0x146   : > { %v827_v48 = vpop.f32.mrb[31].mxu1  ;;  %v2034_v49 = vpop.eup %2033  ;;  %1697 = vst [vmem:[%s2208_s29 + $0x50] sm:$0xff] %v1581_v42   ;;  %2059 = vtanh.f32 %v699_v47 }
 0x147   : > { %v2036_v50 = vpop.eup %2035  ;;  %1713 = vst [vmem:[%s2208_s29 + $0xd0] sm:$0xff] %v1661_v46   ;;  %2061 = vtanh.f32 %v827_v48 }
 0x148   : > { %v2038_v51 = vpop.eup %2037 }
 0x149   : > { %v2040_v52 = vpop.eup %2039 }
 0x14a   : > { %v2042_v53 = vpop.eup %2041  ;;  %v1596_v54 = vpack.c.bf16 %v2040_v52, %v2032_v45 }
 0x14b   : > { %v2044_v55 = vpop.eup %2043  ;;  %v1676_v56 = vpack.c.bf16 %v2042_v53, %v2034_v49 }
 0x14c   : > { %v2046_v57 = vpop.eup %2045  ;;  %1700 = vst [vmem:[%s2208_s29 + $0x68] sm:$0xff] %v1596_v54   ;;  %v1591_v58 = vpack.c.bf16 %v2044_v55, %v2036_v50 }
 0x14d   : > { %v2048_v59 = vpop.eup %2047  ;;  %1716 = vst [vmem:[%s2208_s29 + $0xe8] sm:$0xff] %v1676_v56   ;;  %v1671_v60 = vpack.c.bf16 %v2046_v57, %v2038_v51 }
 0x14e   : > { %v2050_v61 = vpop.eup %2049  ;;  %1699 = vst [vmem:[%s2208_s29 + $0x60] sm:$0xff] %v1591_v58  }
 0x14f   : > { %v2052_v62 = vpop.eup %2051  ;;  %1715 = vst [vmem:[%s2208_s29 + $0xe0] sm:$0xff] %v1671_v60  }
 0x150   : > { %v2054_v63 = vpop.eup %2053 }
 0x151   : > { %v2056_v0 = vpop.eup %2055 }
 0x152   : > { %v2058_v1 = vpop.eup %2057  ;;  %v1606_v2 = vpack.c.bf16 %v2056_v0, %v2048_v59 }
 0x153   : > { %v2060_v3 = vpop.eup %2059  ;;  %v1686_v4 = vpack.c.bf16 %v2058_v1, %v2050_v61 }
 0x154   : > { %v2062_v5 = vpop.eup %2061  ;;  %1702 = vst [vmem:[%s2208_s29 + $0x78] sm:$0xff] %v1606_v2   ;;  %v1601_v6 = vpack.c.bf16 %v2060_v3, %v2052_v62 }
 0x155   : > { %1718 = vst [vmem:[%s2208_s29 + $0xf8] sm:$0xff] %v1686_v4   ;;  %v1681_v7 = vpack.c.bf16 %v2062_v5, %v2054_v63 }
 0x156   : > { %1701 = vst [vmem:[%s2208_s29 + $0x70] sm:$0xff] %v1601_v6  }
 0x157   : > { %1717 = vst [vmem:[%s2208_s29 + $0xf0] sm:$0xff] %v1681_v7  }
 0x158 PF: > { %s12_s13 = sadd.s32 1, %s2101_s13   ;;  %s2260_s9 = smov %s2093_s11 }
 0x159   : > { %p9_p7 = scmp.ge.s32.totalorder %s12_s13, 18   ;;  %s2261_s10 = smov %s2097_s12 }
 0x15a   : > { %s2262_s11 = smov %s2265_s14  ;;  %s2263_s12 = smov %s2269_s15 }
 0x15b   :  { %11 = sbr.rel (!%p9_p7) target bundleno = 3 (0x3), region = 61 }

</bundles_post_ra>
